<compile_context>
chip_gen: v6e
topology: v6e:2x2x1
jax: 0.10.0
libtpu: 0.0.40
codegen_flags: <defaults>
</compile_context>

<pallas_src>
import functools
import numpy as np
import jax
import jax.numpy as jnp
from jax.experimental import pallas as pl
from jax.experimental.pallas import tpu as pltpu

EPS = 1e-5  # nn.InstanceNorm2d default eps
VMEM_LIMIT = 64 * 1024 * 1024


def _round_up(x, m):
    return (x + m - 1) // m * m


# ---------------------------------------------------------------------------
# Pallas kernels
# ---------------------------------------------------------------------------

def head_kernel(z_ref, w_ref, g_ref, b_ref, o_ref, *, slope, hw, cout):
    """First layer: ConvTranspose2d(k=4,s=1,p=0) on a 1x1 input == one matmul,
    fused with InstanceNorm2d(affine) + LeakyReLU.
    z_ref: (Bp, Kp) bf16   w_ref: (Kp, hw*cout) bf16
    g_ref/b_ref: (1, cout) f32   o_ref: (Bp, hw, cout) bf16."""
    bp = z_ref.shape[0]
    y = jnp.dot(z_ref[...], w_ref[...], preferred_element_type=jnp.float32)
    y = y.reshape(bp, hw, cout)
    mean = jnp.mean(y, axis=1, keepdims=True)
    var = jnp.mean(y * y, axis=1, keepdims=True) - mean * mean
    y = (y - mean) * jax.lax.rsqrt(var + EPS)
    y = y * g_ref[...][None] + b_ref[...][None]
    y = jnp.where(y >= 0, y, slope * y)
    o_ref[...] = y.astype(o_ref.dtype)


def _phase_accumulate(xp, w_ref, H, W, cin, cout):
    """Sub-pixel decomposition of ConvTranspose2d(k=4, s=2, p=1) for one sample.

    xp:    (H+2, W+2, cin) border-padded (by 1) UNDILATED input, bf16.
    w_ref: (4, 4*cin, cout) per-phase fused tap matrices; phase p = ph*2+pw, with the
           four K-blocks ordered (a,b) in {0,1}^2 and block (a,b) holding
           weight[:, :, (3-ph)-2a, (3-pw)-2b].
    Returns 4 f32 accumulators acc[ph*2+pw] of shape (H*W, cout) with
    out[2i+ph, 2j+pw, :] = acc[ph*2+pw][i*W + j, :].
    """
    # Three width-shifted, row-flattened slabs so every tap window below is just a
    # contiguous sublane-range slice (done 3x per layer instead of per tap).
    xs = [xp[:, c:c + W, :].reshape((H + 2) * W, cin) for c in range(3)]
    accs = []
    for ph in range(2):
        for pw in range(2):
            p = ph * 2 + pw
            blocks = []
            for a in range(2):
                for b in range(2):
                    r0 = (ph + a) * W
                    blocks.append(xs[pw + b][r0:r0 + H * W, :])
            # One matmul per phase: K = 4*cin (the four taps fused along K).
            xcat = jnp.concatenate(blocks, axis=-1)            # (H*W, 4*cin)
            accs.append(jnp.dot(xcat, w_ref[p],
                                preferred_element_type=jnp.float32))
    return accs


def _interleaved_store(o_ref, halves_by_phase, H, W, cout):
    """halves_by_phase[ph] = [y_pw0, y_pw1], each (H*W, cout).
    Stores the full (1, H, 2, W, 2*cout) block; the caller-side collapse to
    (2H, 2W, cout) NHWC is then a free row-major reshape."""
    rows = []
    for ph in range(2):
        y_ph = jnp.concatenate(halves_by_phase[ph], axis=-1)      # (H*W, 2*cout)
        rows.append(y_ph.reshape(1, H, 1, W, 2 * cout))
    o_ref[...] = jnp.concatenate(rows, axis=2)                    # (1, H, 2, W, 2*cout)


def tconv2x_norm_lrelu_kernel(xp_ref, w_ref, g_ref, b_ref, o_ref, *,
                              slope, H, W, cin, cout):
    """ConvTranspose2d(k=4,s=2,p=1,bias=False) + InstanceNorm2d(affine) + LeakyReLU
    for one batch sample (grid over batch).  Output block (1, H, 2, W, 2*cout) bf16."""
    accs = _phase_accumulate(xp_ref[0], w_ref, H, W, cin, cout)
    # One-pass InstanceNorm statistics (f32) over all 4*H*W output positions.
    s = jnp.zeros((1, cout), jnp.float32)
    ss = jnp.zeros((1, cout), jnp.float32)
    for acc in accs:
        s = s + jnp.sum(acc, axis=0, keepdims=True)
        ss = ss + jnp.sum(acc * acc, axis=0, keepdims=True)
    n = float(4 * H * W)
    mean = s / n
    var = ss / n - mean * mean
    scale = g_ref[...] * jax.lax.rsqrt(var + EPS)                 # (1, cout)
    shift = b_ref[...] - mean * scale
    halves = []
    for ph in range(2):
        hs = []
        for pw in range(2):
            y = accs[ph * 2 + pw] * scale + shift
            y = jnp.where(y >= 0, y, slope * y)
            hs.append(y.astype(o_ref.dtype))
        halves.append(hs)
    _interleaved_store(o_ref, halves, H, W, cout)


def tconv2x_bias_tanh_kernel(xp_ref, w_ref, bias_ref, o_ref, *, H, W, cin, cout):
    """Final ConvTranspose2d(k=4,s=2,p=1,bias=True) + Tanh (f32 output)."""
    accs = _phase_accumulate(xp_ref[0], w_ref, H, W, cin, cout)
    halves = []
    for ph in range(2):
        hs = []
        for pw in range(2):
            hs.append(jnp.tanh(accs[ph * 2 + pw] + bias_ref[...]))
        halves.append(hs)
    _interleaved_store(o_ref, halves, H, W, cout)


# ---------------------------------------------------------------------------
# Glue: weight packing for the sub-pixel decomposition
# ---------------------------------------------------------------------------

def _phase_tap_weights(wt, dtype):
    """ConvTranspose2d weight (Cin, Cout, 4, 4) -> (4, 4*Cin, Cout).
    Phase p = ph*2+pw; its K axis is the four (a,b) blocks (a-major, b-minor), block
    (a,b) = weight[:, :, (3-ph)-2a, (3-pw)-2b].  Matches _phase_accumulate's X layout."""
    phases = []
    for ph in range(2):
        for pw in range(2):
            blocks = []
            for a in range(2):
                for b in range(2):
                    blocks.append(wt[:, :, (3 - ph) - 2 * a, (3 - pw) - 2 * b])
            phases.append(jnp.concatenate(blocks, axis=0))        # (4*Cin, Cout)
    return jnp.stack(phases, axis=0).astype(dtype)                # (4, 4*Cin, Cout)


# ---------------------------------------------------------------------------
# Layer wrappers (pallas_call)
# ---------------------------------------------------------------------------

def head_layer(z, w, gamma, beta, slope):
    B, cin = z.shape
    cout, kh, kw = w.shape[1], w.shape[2], w.shape[3]
    hw = kh * kw
    kp = _round_up(cin, 128)       # pad contraction dim to 128 lanes
    bp = _round_up(B, 8)           # pad batch to 8 sublanes
    wm = jnp.transpose(w, (0, 2, 3, 1)).reshape(cin, hw * cout)
    wm = jnp.pad(wm, ((0, kp - cin), (0, 0))).astype(jnp.bfloat16)
    zp = jnp.pad(z, ((0, bp - B), (0, kp - cin))).astype(jnp.bfloat16)
    g = gamma.reshape(1, cout).astype(jnp.float32)
    b = beta.reshape(1, cout).astype(jnp.float32)
    out = pl.pallas_call(
        functools.partial(head_kernel, slope=slope, hw=hw, cout=cout),
        out_shape=jax.ShapeDtypeStruct((bp, hw, cout), jnp.bfloat16),
        grid=(1,),
        in_specs=[pl.BlockSpec((bp, kp), lambda i: (0, 0)),
                  pl.BlockSpec((kp, hw * cout), lambda i: (0, 0)),
                  pl.BlockSpec((1, cout), lambda i: (0, 0)),
                  pl.BlockSpec((1, cout), lambda i: (0, 0))],
        out_specs=pl.BlockSpec((bp, hw, cout), lambda i: (0, 0, 0)),
        compiler_params=pltpu.CompilerParams(
            dimension_semantics=("arbitrary",),
            vmem_limit_bytes=VMEM_LIMIT),
    )(zp, wm, g, b)
    return out[:B].reshape(B, kh, kw, cout)      # NHWC (B, 4, 4, cout) bf16


def mid_layer(x_nhwc, wt, gamma, beta, slope):
    B, H, W, cin = x_nhwc.shape
    cout = wt.shape[1]
    xp = jnp.pad(x_nhwc, ((0, 0), (1, 1), (1, 1), (0, 0)))   # border pad only (no dilation)
    wtaps = _phase_tap_weights(wt, jnp.bfloat16)             # (4, 4*cin, cout)
    g = gamma.reshape(1, cout).astype(jnp.float32)
    b = beta.reshape(1, cout).astype(jnp.float32)
    out = pl.pallas_call(
        functools.partial(tconv2x_norm_lrelu_kernel, slope=slope,
                          H=H, W=W, cin=cin, cout=cout),
        out_shape=jax.ShapeDtypeStruct((B, H, 2, W, 2 * cout), jnp.bfloat16),
        grid=(B,),
        in_specs=[pl.BlockSpec((1, H + 2, W + 2, cin), lambda i: (i, 0, 0, 0)),
                  pl.BlockSpec((4, 4 * cin, cout), lambda i: (0, 0, 0)),
                  pl.BlockSpec((1, cout), lambda i: (0, 0)),
                  pl.BlockSpec((1, cout), lambda i: (0, 0))],
        out_specs=pl.BlockSpec((1, H, 2, W, 2 * cout), lambda i: (i, 0, 0, 0, 0)),
        compiler_params=pltpu.CompilerParams(
            dimension_semantics=("parallel",),
            vmem_limit_bytes=VMEM_LIMIT),
    )(xp, wtaps, g, b)
    # (B, H, 2, W, 2*cout) -> (B, 2H, 2W, cout) is a free row-major collapse.
    return out.reshape(B, 2 * H, 2 * W, cout)


def tail_layer(x_nhwc, wt, bias):
    B, H, W, cin = x_nhwc.shape
    cout = wt.shape[1]
    xp = jnp.pad(x_nhwc, ((0, 0), (1, 1), (1, 1), (0, 0)))
    wtaps = _phase_tap_weights(wt, jnp.bfloat16)             # (4, 4*cin, cout)
    bb = bias.reshape(1, cout).astype(jnp.float32)
    out = pl.pallas_call(
        functools.partial(tconv2x_bias_tanh_kernel, H=H, W=W, cin=cin, cout=cout),
        out_shape=jax.ShapeDtypeStruct((B, H, 2, W, 2 * cout), jnp.float32),
        grid=(B,),
        in_specs=[pl.BlockSpec((1, H + 2, W + 2, cin), lambda i: (i, 0, 0, 0)),
                  pl.BlockSpec((4, 4 * cin, cout), lambda i: (0, 0, 0)),
                  pl.BlockSpec((1, cout), lambda i: (0, 0))],
        out_specs=pl.BlockSpec((1, H, 2, W, 2 * cout), lambda i: (i, 0, 0, 0, 0)),
        compiler_params=pltpu.CompilerParams(
            dimension_semantics=("parallel",),
            vmem_limit_bytes=VMEM_LIMIT),
    )(xp, wtaps, bb)
    return out.reshape(B, 2 * H, 2 * W, cout)    # NHWC f32


# ---------------------------------------------------------------------------
# Parameters & forward
# ---------------------------------------------------------------------------

def init_params(key, nz, ngf, nc, n_classes, image_size):
    assert image_size % 16 == 0
    mult = image_size // 8
    params = {"mid": []}
    cin = nz + n_classes
    c = ngf * mult
    key, k1, k2, k3 = jax.random.split(key, 4)
    params["head"] = dict(
        w=0.05 * jax.random.normal(k1, (cin, c, 4, 4), jnp.float32),
        gamma=1.0 + 0.1 * jax.random.normal(k2, (c,), jnp.float32),
        beta=0.1 * jax.random.normal(k3, (c,), jnp.float32),
    )
    while mult > 1:
        ci, co = ngf * mult, ngf * (mult // 2)
        key, k1, k2, k3 = jax.random.split(key, 4)
        params["mid"].append(dict(
            w=0.05 * jax.random.normal(k1, (ci, co, 4, 4), jnp.float32),
            gamma=1.0 + 0.1 * jax.random.normal(k2, (co,), jnp.float32),
            beta=0.1 * jax.random.normal(k3, (co,), jnp.float32),
        ))
        mult //= 2
    key, k1, k2 = jax.random.split(key, 3)
    params["tail"] = dict(
        w=0.05 * jax.random.normal(k1, (ngf, nc, 4, 4), jnp.float32),
        bias=0.1 * jax.random.normal(k2, (nc,), jnp.float32),
    )
    return params


def tconv_generator_forward(x_nchw, class_labels, params, *, n_classes, slope,
                            dropout=0.0):
    # TODO(synk): training-mode stochastic nn.Dropout not implemented; p=0.0 -> identity.
    assert dropout == 0.0
    B = x_nchw.shape[0]
    onehot = jax.nn.one_hot(class_labels, n_classes, dtype=jnp.float32)
    z = jnp.concatenate([x_nchw.reshape(B, -1), onehot], axis=1)  # (B, nz+n_classes)
    h = head_layer(z, params["head"]["w"], params["head"]["gamma"],
                   params["head"]["beta"], slope)
    for lyr in params["mid"]:
        h = mid_layer(h, lyr["w"], lyr["gamma"], lyr["beta"], slope)
    out = tail_layer(h, params["tail"]["w"], params["tail"]["bias"])
    # Only the small nc-channel final image is transposed to NCHW in XLA; all
    # wide-channel activations stayed channels-last (lane-dense) end to end.
    return jnp.transpose(out, (0, 3, 1, 2))


# ---------------------------------------------------------------------------
# NumPy reference (direct PyTorch semantics) for correctness check
# ---------------------------------------------------------------------------

def _ref_tconv(x, w, stride, pad, bias=None):
    B, Cin, H, W = x.shape
    Cout, K = w.shape[1], w.shape[2]
    Hout = (H - 1) * stride - 2 * pad + K
    Wout = (W - 1) * stride - 2 * pad + K
    out = np.zeros((B, Cout, Hout, Wout), np.float64)
    for ih in range(H):
        for iw in range(W):
            for kh in range(K):
                for kw in range(K):
                    oh = ih * stride - pad + kh
                    ow = iw * stride - pad + kw
                    if 0 <= oh < Hout and 0 <= ow < Wout:
                        out[:, :, oh, ow] += np.einsum(
                            'bi,io->bo', x[:, :, ih, iw], w[:, :, kh, kw])
    if bias is not None:
        out += bias.reshape(1, -1, 1, 1)
    return out


def _ref_inorm_lrelu(x, g, b, slope, eps=EPS):
    mean = x.mean(axis=(2, 3), keepdims=True)
    var = x.var(axis=(2, 3), keepdims=True)
    y = (x - mean) / np.sqrt(var + eps)
    y = y * g.reshape(1, -1, 1, 1) + b.reshape(1, -1, 1, 1)
    return np.where(y >= 0, y, slope * y)


def ref_forward(x, labels, params, n_classes, slope):
    onehot = np.eye(n_classes, dtype=np.float64)[labels]
    z = np.concatenate([x.reshape(x.shape[0], -1), onehot], axis=1)
    h = z[:, :, None, None]
    h = _ref_tconv(h, params["head"]["w"], 1, 0)
    h = _ref_inorm_lrelu(h, params["head"]["gamma"], params["head"]["beta"], slope)
    for lyr in params["mid"]:
        h = _ref_tconv(h, lyr["w"], 2, 1)
        h = _ref_inorm_lrelu(h, lyr["gamma"], lyr["beta"], slope)
    h = _ref_tconv(h, params["tail"]["w"], 2, 1, bias=params["tail"]["bias"])
    return np.tanh(h)


# ---------------------------------------------------------------------------

if __name__ == "__main__":
    nz, ngf, nc, n_classes, image_size = 8, 8, 3, 4, 16
    slope, dropout = 0.2, 0.0
    B = 2

    key = jax.random.PRNGKey(0)
    kx, kl, kp = jax.random.split(key, 3)
    x = jax.random.normal(kx, (B, nz, 1, 1), jnp.float32)          # NCHW latent
    labels = jax.random.randint(kl, (B,), 0, n_classes)
    params = init_params(kp, nz, ngf, nc, n_classes, image_size)

    fwd = jax.jit(functools.partial(tconv_generator_forward,
                                    n_classes=n_classes, slope=slope,
                                    dropout=dropout))
    out = jax.block_until_ready(fwd(x, labels, params))

    assert out.shape == (B, nc, image_size, image_size)
    np_params = jax.tree_util.tree_map(np.asarray, params)
    ref = ref_forward(np.asarray(x), np.asarray(labels), np_params,
                      n_classes, slope)
    # bf16 weights/activations inside the Pallas layers -> compare at bf16-level
    # tolerance against the float64 reference (f32 accumulation & stats inside).
    np.testing.assert_allclose(np.asarray(out), ref, rtol=5e-2, atol=5e-2)
    print("KERNEL_OK")
</pallas_src>

<mosaic_0001>
module attributes {stable_mosaic.version = 11 : i64} {
  func.func @tconv2x_norm_lrelu_kernel(%arg0: i32, %arg1: memref<1x6x6x16xbf16, #tpu.memory_space<vmem>>, %arg2: memref<4x64x8xbf16, #tpu.memory_space<vmem>>, %arg3: memref<1x8xf32, #tpu.memory_space<vmem>>, %arg4: memref<1x8xf32, #tpu.memory_space<vmem>>, %arg5: memref<1x4x2x4x16xbf16, #tpu.memory_space<vmem>>) attributes {dimension_semantics = [#tpu.dimension_semantics<parallel>], iteration_bounds = array<i64: 2>, scalar_prefetch = 0 : i64, scratch_operands = 0 : i64, tpu.core_type = #tpu.core_type<tc>, window_params = [{transform_indices = @transform_0, window_bounds = array<i64: 1, 6, 6, 16>}, {pipeline_mode = #tpu.pipeline_mode<synchronous>, transform_indices = @transform_1, window_bounds = array<i64: 4, 64, 8>}, {pipeline_mode = #tpu.pipeline_mode<synchronous>, transform_indices = @transform_2, window_bounds = array<i64: 1, 8>}, {pipeline_mode = #tpu.pipeline_mode<synchronous>, transform_indices = @transform_3, window_bounds = array<i64: 1, 8>}, {transform_indices = @transform_4, window_bounds = array<i64: 1, 4, 2, 4, 16>}]} {
    %c0 = arith.constant 0 : index
    %c0_0 = arith.constant 0 : index
    %c0_1 = arith.constant 0 : index
    %c0_2 = arith.constant 0 : index
    %0 = vector.load %arg1[%c0, %c0_0, %c0_1, %c0_2] : memref<1x6x6x16xbf16, #tpu.memory_space<vmem>>, vector<1x6x6x16xbf16>
    %1 = vector.shape_cast %0 : vector<1x6x6x16xbf16> to vector<6x6x16xbf16>
    %2 = vector.extract_strided_slice %1 {offsets = [0, 0, 0], sizes = [6, 4, 16], strides = [1, 1, 1]} : vector<6x6x16xbf16> to vector<6x4x16xbf16>
    %3 = vector.shape_cast %2 : vector<6x4x16xbf16> to vector<24x16xbf16>
    %4 = vector.extract_strided_slice %1 {offsets = [0, 1, 0], sizes = [6, 4, 16], strides = [1, 1, 1]} : vector<6x6x16xbf16> to vector<6x4x16xbf16>
    %5 = vector.shape_cast %4 : vector<6x4x16xbf16> to vector<24x16xbf16>
    %6 = vector.extract_strided_slice %1 {offsets = [0, 2, 0], sizes = [6, 4, 16], strides = [1, 1, 1]} : vector<6x6x16xbf16> to vector<6x4x16xbf16>
    %7 = vector.shape_cast %6 : vector<6x4x16xbf16> to vector<24x16xbf16>
    %8 = vector.extract_strided_slice %3 {offsets = [0, 0], sizes = [16, 16], strides = [1, 1]} : vector<24x16xbf16> to vector<16x16xbf16>
    %9 = vector.extract_strided_slice %5 {offsets = [0, 0], sizes = [16, 16], strides = [1, 1]} : vector<24x16xbf16> to vector<16x16xbf16>
    %10 = vector.extract_strided_slice %3 {offsets = [4, 0], sizes = [16, 16], strides = [1, 1]} : vector<24x16xbf16> to vector<16x16xbf16>
    %11 = vector.extract_strided_slice %5 {offsets = [4, 0], sizes = [16, 16], strides = [1, 1]} : vector<24x16xbf16> to vector<16x16xbf16>
    %12 = tpu.concatenate %8, %9, %10, %11 in 1 : vector<16x16xbf16>, vector<16x16xbf16>, vector<16x16xbf16>, vector<16x16xbf16> -> vector<16x64xbf16>
    %c0_3 = arith.constant 0 : index
    %c0_4 = arith.constant 0 : index
    %c0_5 = arith.constant 0 : index
    %13 = vector.load %arg2[%c0_3, %c0_4, %c0_5] : memref<4x64x8xbf16, #tpu.memory_space<vmem>>, vector<1x64x8xbf16>
    %14 = vector.shape_cast %13 : vector<1x64x8xbf16> to vector<64x8xbf16>
    %cst = arith.constant dense<0.000000e+00> : vector<16x8xf32>
    %15 = tpu.matmul %12, %14, %cst {dimension_numbers = #tpu.dot_dimension_numbers<[1], [0], [0], [1], [0, 0, 1, 1], [], []>} : vector<16x64xbf16>, vector<64x8xbf16>, vector<16x8xf32> -> vector<16x8xf32>
    %16 = vector.extract_strided_slice %5 {offsets = [0, 0], sizes = [16, 16], strides = [1, 1]} : vector<24x16xbf16> to vector<16x16xbf16>
    %17 = vector.extract_strided_slice %7 {offsets = [0, 0], sizes = [16, 16], strides = [1, 1]} : vector<24x16xbf16> to vector<16x16xbf16>
    %18 = vector.extract_strided_slice %5 {offsets = [4, 0], sizes = [16, 16], strides = [1, 1]} : vector<24x16xbf16> to vector<16x16xbf16>
    %19 = vector.extract_strided_slice %7 {offsets = [4, 0], sizes = [16, 16], strides = [1, 1]} : vector<24x16xbf16> to vector<16x16xbf16>
    %20 = tpu.concatenate %16, %17, %18, %19 in 1 : vector<16x16xbf16>, vector<16x16xbf16>, vector<16x16xbf16>, vector<16x16xbf16> -> vector<16x64xbf16>
    %c1 = arith.constant 1 : index
    %c0_6 = arith.constant 0 : index
    %c0_7 = arith.constant 0 : index
    %21 = vector.load %arg2[%c1, %c0_6, %c0_7] : memref<4x64x8xbf16, #tpu.memory_space<vmem>>, vector<1x64x8xbf16>
    %22 = vector.shape_cast %21 : vector<1x64x8xbf16> to vector<64x8xbf16>
    %cst_8 = arith.constant dense<0.000000e+00> : vector<16x8xf32>
    %23 = tpu.matmul %20, %22, %cst_8 {dimension_numbers = #tpu.dot_dimension_numbers<[1], [0], [0], [1], [0, 0, 1, 1], [], []>} : vector<16x64xbf16>, vector<64x8xbf16>, vector<16x8xf32> -> vector<16x8xf32>
    %24 = vector.extract_strided_slice %3 {offsets = [4, 0], sizes = [16, 16], strides = [1, 1]} : vector<24x16xbf16> to vector<16x16xbf16>
    %25 = vector.extract_strided_slice %5 {offsets = [4, 0], sizes = [16, 16], strides = [1, 1]} : vector<24x16xbf16> to vector<16x16xbf16>
    %26 = vector.extract_strided_slice %3 {offsets = [8, 0], sizes = [16, 16], strides = [1, 1]} : vector<24x16xbf16> to vector<16x16xbf16>
    %27 = vector.extract_strided_slice %5 {offsets = [8, 0], sizes = [16, 16], strides = [1, 1]} : vector<24x16xbf16> to vector<16x16xbf16>
    %28 = tpu.concatenate %24, %25, %26, %27 in 1 : vector<16x16xbf16>, vector<16x16xbf16>, vector<16x16xbf16>, vector<16x16xbf16> -> vector<16x64xbf16>
    %c2 = arith.constant 2 : index
    %c0_9 = arith.constant 0 : index
    %c0_10 = arith.constant 0 : index
    %29 = vector.load %arg2[%c2, %c0_9, %c0_10] : memref<4x64x8xbf16, #tpu.memory_space<vmem>>, vector<1x64x8xbf16>
    %30 = vector.shape_cast %29 : vector<1x64x8xbf16> to vector<64x8xbf16>
    %cst_11 = arith.constant dense<0.000000e+00> : vector<16x8xf32>
    %31 = tpu.matmul %28, %30, %cst_11 {dimension_numbers = #tpu.dot_dimension_numbers<[1], [0], [0], [1], [0, 0, 1, 1], [], []>} : vector<16x64xbf16>, vector<64x8xbf16>, vector<16x8xf32> -> vector<16x8xf32>
    %32 = vector.extract_strided_slice %5 {offsets = [4, 0], sizes = [16, 16], strides = [1, 1]} : vector<24x16xbf16> to vector<16x16xbf16>
    %33 = vector.extract_strided_slice %7 {offsets = [4, 0], sizes = [16, 16], strides = [1, 1]} : vector<24x16xbf16> to vector<16x16xbf16>
    %34 = vector.extract_strided_slice %5 {offsets = [8, 0], sizes = [16, 16], strides = [1, 1]} : vector<24x16xbf16> to vector<16x16xbf16>
    %35 = vector.extract_strided_slice %7 {offsets = [8, 0], sizes = [16, 16], strides = [1, 1]} : vector<24x16xbf16> to vector<16x16xbf16>
    %36 = tpu.concatenate %32, %33, %34, %35 in 1 : vector<16x16xbf16>, vector<16x16xbf16>, vector<16x16xbf16>, vector<16x16xbf16> -> vector<16x64xbf16>
    %c3 = arith.constant 3 : index
    %c0_12 = arith.constant 0 : index
    %c0_13 = arith.constant 0 : index
    %37 = vector.load %arg2[%c3, %c0_12, %c0_13] : memref<4x64x8xbf16, #tpu.memory_space<vmem>>, vector<1x64x8xbf16>
    %38 = vector.shape_cast %37 : vector<1x64x8xbf16> to vector<64x8xbf16>
    %cst_14 = arith.constant dense<0.000000e+00> : vector<16x8xf32>
    %39 = tpu.matmul %36, %38, %cst_14 {dimension_numbers = #tpu.dot_dimension_numbers<[1], [0], [0], [1], [0, 0, 1, 1], [], []>} : vector<16x64xbf16>, vector<64x8xbf16>, vector<16x8xf32> -> vector<16x8xf32>
    %cst_15 = arith.constant 0.000000e+00 : f32
    %40 = vector.broadcast %cst_15 : f32 to vector<1x8xf32>
    %cst_16 = arith.constant 0.000000e+00 : f32
    %41 = vector.broadcast %cst_16 : f32 to vector<1x8xf32>
    %cst_17 = arith.constant dense<0.000000e+00> : vector<8xf32>
    %42 = vector.multi_reduction <add>, %15, %cst_17 [0] : vector<16x8xf32> to vector<8xf32>
    %43 = vector.shape_cast %42 : vector<8xf32> to vector<1x8xf32>
    %44 = arith.addf %40, %43 : vector<1x8xf32>
    %45 = arith.mulf %15, %15 : vector<16x8xf32>
    %cst_18 = arith.constant dense<0.000000e+00> : vector<8xf32>
    %46 = vector.multi_reduction <add>, %45, %cst_18 [0] : vector<16x8xf32> to vector<8xf32>
    %47 = vector.shape_cast %46 : vector<8xf32> to vector<1x8xf32>
    %48 = arith.addf %41, %47 : vector<1x8xf32>
    %cst_19 = arith.constant dense<0.000000e+00> : vector<8xf32>
    %49 = vector.multi_reduction <add>, %23, %cst_19 [0] : vector<16x8xf32> to vector<8xf32>
    %50 = vector.shape_cast %49 : vector<8xf32> to vector<1x8xf32>
    %51 = arith.addf %44, %50 : vector<1x8xf32>
    %52 = arith.mulf %23, %23 : vector<16x8xf32>
    %cst_20 = arith.constant dense<0.000000e+00> : vector<8xf32>
    %53 = vector.multi_reduction <add>, %52, %cst_20 [0] : vector<16x8xf32> to vector<8xf32>
    %54 = vector.shape_cast %53 : vector<8xf32> to vector<1x8xf32>
    %55 = arith.addf %48, %54 : vector<1x8xf32>
    %cst_21 = arith.constant dense<0.000000e+00> : vector<8xf32>
    %56 = vector.multi_reduction <add>, %31, %cst_21 [0] : vector<16x8xf32> to vector<8xf32>
    %57 = vector.shape_cast %56 : vector<8xf32> to vector<1x8xf32>
    %58 = arith.addf %51, %57 : vector<1x8xf32>
    %59 = arith.mulf %31, %31 : vector<16x8xf32>
    %cst_22 = arith.constant dense<0.000000e+00> : vector<8xf32>
    %60 = vector.multi_reduction <add>, %59, %cst_22 [0] : vector<16x8xf32> to vector<8xf32>
    %61 = vector.shape_cast %60 : vector<8xf32> to vector<1x8xf32>
    %62 = arith.addf %55, %61 : vector<1x8xf32>
    %cst_23 = arith.constant dense<0.000000e+00> : vector<8xf32>
    %63 = vector.multi_reduction <add>, %39, %cst_23 [0] : vector<16x8xf32> to vector<8xf32>
    %64 = vector.shape_cast %63 : vector<8xf32> to vector<1x8xf32>
    %65 = arith.addf %58, %64 : vector<1x8xf32>
    %66 = arith.mulf %39, %39 : vector<16x8xf32>
    %cst_24 = arith.constant dense<0.000000e+00> : vector<8xf32>
    %67 = vector.multi_reduction <add>, %66, %cst_24 [0] : vector<16x8xf32> to vector<8xf32>
    %68 = vector.shape_cast %67 : vector<8xf32> to vector<1x8xf32>
    %69 = arith.addf %62, %68 : vector<1x8xf32>
    %cst_25 = arith.constant 6.400000e+01 : f32
    %70 = vector.broadcast %cst_25 : f32 to vector<1x8xf32>
    %71 = arith.divf %65, %70 : vector<1x8xf32>
    %cst_26 = arith.constant 6.400000e+01 : f32
    %72 = vector.broadcast %cst_26 : f32 to vector<1x8xf32>
    %73 = arith.divf %69, %72 : vector<1x8xf32>
    %74 = arith.mulf %71, %71 : vector<1x8xf32>
    %75 = arith.subf %73, %74 : vector<1x8xf32>
    %c0_27 = arith.constant 0 : index
    %c0_28 = arith.constant 0 : index
    %76 = vector.load %arg3[%c0_27, %c0_28] : memref<1x8xf32, #tpu.memory_space<vmem>>, vector<1x8xf32>
    %cst_29 = arith.constant 9.99999974E-6 : f32
    %77 = vector.broadcast %cst_29 : f32 to vector<1x8xf32>
    %78 = arith.addf %75, %77 : vector<1x8xf32>
    %79 = math.rsqrt %78 : vector<1x8xf32>
    %80 = arith.mulf %76, %79 : vector<1x8xf32>
    %c0_30 = arith.constant 0 : index
    %c0_31 = arith.constant 0 : index
    %81 = vector.load %arg4[%c0_30, %c0_31] : memref<1x8xf32, #tpu.memory_space<vmem>>, vector<1x8xf32>
    %82 = arith.mulf %71, %80 : vector<1x8xf32>
    %83 = arith.subf %81, %82 : vector<1x8xf32>
    %84 = vector.broadcast %80 : vector<1x8xf32> to vector<16x8xf32>
    %85 = arith.mulf %15, %84 : vector<16x8xf32>
    %86 = vector.broadcast %83 : vector<1x8xf32> to vector<16x8xf32>
    %87 = arith.addf %85, %86 : vector<16x8xf32>
    %cst_32 = arith.constant 0.000000e+00 : f32
    %88 = vector.broadcast %cst_32 : f32 to vector<16x8xf32>
    %89 = arith.cmpf oge, %87, %88 : vector<16x8xf32>
    %cst_33 = arith.constant 2.000000e-01 : f32
    %90 = vector.broadcast %cst_33 : f32 to vector<16x8xf32>
    %91 = arith.mulf %90, %87 : vector<16x8xf32>
    %92 = arith.select %89, %87, %91 : vector<16x8xi1>, vector<16x8xf32>
    %93 = arith.truncf %92 : vector<16x8xf32> to vector<16x8xbf16>
    %94 = vector.broadcast %80 : vector<1x8xf32> to vector<16x8xf32>
    %95 = arith.mulf %23, %94 : vector<16x8xf32>
    %96 = vector.broadcast %83 : vector<1x8xf32> to vector<16x8xf32>
    %97 = arith.addf %95, %96 : vector<16x8xf32>
    %cst_34 = arith.constant 0.000000e+00 : f32
    %98 = vector.broadcast %cst_34 : f32 to vector<16x8xf32>
    %99 = arith.cmpf oge, %97, %98 : vector<16x8xf32>
    %cst_35 = arith.constant 2.000000e-01 : f32
    %100 = vector.broadcast %cst_35 : f32 to vector<16x8xf32>
    %101 = arith.mulf %100, %97 : vector<16x8xf32>
    %102 = arith.select %99, %97, %101 : vector<16x8xi1>, vector<16x8xf32>
    %103 = arith.truncf %102 : vector<16x8xf32> to vector<16x8xbf16>
    %104 = vector.broadcast %80 : vector<1x8xf32> to vector<16x8xf32>
    %105 = arith.mulf %31, %104 : vector<16x8xf32>
    %106 = vector.broadcast %83 : vector<1x8xf32> to vector<16x8xf32>
    %107 = arith.addf %105, %106 : vector<16x8xf32>
    %cst_36 = arith.constant 0.000000e+00 : f32
    %108 = vector.broadcast %cst_36 : f32 to vector<16x8xf32>
    %109 = arith.cmpf oge, %107, %108 : vector<16x8xf32>
    %cst_37 = arith.constant 2.000000e-01 : f32
    %110 = vector.broadcast %cst_37 : f32 to vector<16x8xf32>
    %111 = arith.mulf %110, %107 : vector<16x8xf32>
    %112 = arith.select %109, %107, %111 : vector<16x8xi1>, vector<16x8xf32>
    %113 = arith.truncf %112 : vector<16x8xf32> to vector<16x8xbf16>
    %114 = vector.broadcast %80 : vector<1x8xf32> to vector<16x8xf32>
    %115 = arith.mulf %39, %114 : vector<16x8xf32>
    %116 = vector.broadcast %83 : vector<1x8xf32> to vector<16x8xf32>
    %117 = arith.addf %115, %116 : vector<16x8xf32>
    %cst_38 = arith.constant 0.000000e+00 : f32
    %118 = vector.broadcast %cst_38 : f32 to vector<16x8xf32>
    %119 = arith.cmpf oge, %117, %118 : vector<16x8xf32>
    %cst_39 = arith.constant 2.000000e-01 : f32
    %120 = vector.broadcast %cst_39 : f32 to vector<16x8xf32>
    %121 = arith.mulf %120, %117 : vector<16x8xf32>
    %122 = arith.select %119, %117, %121 : vector<16x8xi1>, vector<16x8xf32>
    %123 = arith.truncf %122 : vector<16x8xf32> to vector<16x8xbf16>
    %124 = tpu.concatenate %93, %103 in 1 : vector<16x8xbf16>, vector<16x8xbf16> -> vector<16x16xbf16>
    %125 = vector.shape_cast %124 : vector<16x16xbf16> to vector<1x4x1x4x16xbf16>
    %126 = tpu.concatenate %113, %123 in 1 : vector<16x8xbf16>, vector<16x8xbf16> -> vector<16x16xbf16>
    %127 = vector.shape_cast %126 : vector<16x16xbf16> to vector<1x4x1x4x16xbf16>
    %128 = tpu.concatenate %125, %127 in 2 : vector<1x4x1x4x16xbf16>, vector<1x4x1x4x16xbf16> -> vector<1x4x2x4x16xbf16>
    %c0_40 = arith.constant 0 : index
    %c0_41 = arith.constant 0 : index
    %c0_42 = arith.constant 0 : index
    %c0_43 = arith.constant 0 : index
    %c0_44 = arith.constant 0 : index
    %129 = vector.load %arg5[%c0_40, %c0_41, %c0_42, %c0_43, %c0_44] : memref<1x4x2x4x16xbf16, #tpu.memory_space<vmem>>, vector<1x4x2x4x16xbf16>
    tpu.vector_store %arg5[%c0_40, %c0_41, %c0_42, %c0_43, %c0_44], %128 {strides = array<i32>} : memref<1x4x2x4x16xbf16, #tpu.memory_space<vmem>>, vector<1x4x2x4x16xbf16>,
    return
  }
  func.func @transform_0(%arg0: i32) -> (i32, i32, i32, i32) {
    %c0_i32 = arith.constant 0 : i32
    %c0_i32_0 = arith.constant 0 : i32
    %c0_i32_1 = arith.constant 0 : i32
    %c0_i32_2 = arith.constant 0 : i32
    return %arg0, %c0_i32, %c0_i32_0, %c0_i32_1 : i32, i32, i32, i32
  }
  func.func @transform_1(%arg0: i32) -> (i32, i32, i32) {
    %c0_i32 = arith.constant 0 : i32
    %c0_i32_0 = arith.constant 0 : i32
    %c0_i32_1 = arith.constant 0 : i32
    %c0_i32_2 = arith.constant 0 : i32
    return %c0_i32, %c0_i32_0, %c0_i32_1 : i32, i32, i32
  }
  func.func @transform_2(%arg0: i32) -> (i32, i32) {
    %c0_i32 = arith.constant 0 : i32
    %c0_i32_0 = arith.constant 0 : i32
    %c0_i32_1 = arith.constant 0 : i32
    return %c0_i32, %c0_i32_0 : i32, i32
  }
  func.func @transform_3(%arg0: i32) -> (i32, i32) {
    %c0_i32 = arith.constant 0 : i32
    %c0_i32_0 = arith.constant 0 : i32
    %c0_i32_1 = arith.constant 0 : i32
    return %c0_i32, %c0_i32_0 : i32, i32
  }
  func.func @transform_4(%arg0: i32) -> (i32, i32, i32, i32, i32) {
    %c0_i32 = arith.constant 0 : i32
    %c0_i32_0 = arith.constant 0 : i32
    %c0_i32_1 = arith.constant 0 : i32
    %c0_i32_2 = arith.constant 0 : i32
    %c0_i32_3 = arith.constant 0 : i32
    return %arg0, %c0_i32, %c0_i32_0, %c0_i32_1, %c0_i32_2 : i32, i32, i32, i32, i32
  }
}

module attributes {stable_mosaic.version = 11 : i64} {
  func.func @head_kernel(%arg0: i32, %arg1: memref<8x128xbf16, #tpu.memory_space<vmem>>, %arg2: memref<128x256xbf16, #tpu.memory_space<vmem>>, %arg3: memref<1x16xf32, #tpu.memory_space<vmem>>, %arg4: memref<1x16xf32, #tpu.memory_space<vmem>>, %arg5: memref<8x16x16xbf16, #tpu.memory_space<vmem>>) attributes {dimension_semantics = [#tpu.dimension_semantics<arbitrary>], iteration_bounds = array<i64: 1>, scalar_prefetch = 0 : i64, scratch_operands = 0 : i64, tpu.core_type = #tpu.core_type<tc>, window_params = [{pipeline_mode = #tpu.pipeline_mode<synchronous>, transform_indices = @transform_0, window_bounds = array<i64: 8, 128>}, {pipeline_mode = #tpu.pipeline_mode<synchronous>, transform_indices = @transform_1, window_bounds = array<i64: 128, 256>}, {pipeline_mode = #tpu.pipeline_mode<synchronous>, transform_indices = @transform_2, window_bounds = array<i64: 1, 16>}, {pipeline_mode = #tpu.pipeline_mode<synchronous>, transform_indices = @transform_3, window_bounds = array<i64: 1, 16>}, {pipeline_mode = #tpu.pipeline_mode<synchronous>, transform_indices = @transform_4, window_bounds = array<i64: 8, 16, 16>}]} {
    %c0 = arith.constant 0 : index
    %c0_0 = arith.constant 0 : index
    %0 = vector.load %arg1[%c0, %c0_0] : memref<8x128xbf16, #tpu.memory_space<vmem>>, vector<8x128xbf16>
    %c0_1 = arith.constant 0 : index
    %c0_2 = arith.constant 0 : index
    %1 = vector.load %arg2[%c0_1, %c0_2] : memref<128x256xbf16, #tpu.memory_space<vmem>>, vector<128x256xbf16>
    %cst = arith.constant dense<0.000000e+00> : vector<8x256xf32>
    %2 = tpu.matmul %0, %1, %cst {dimension_numbers = #tpu.dot_dimension_numbers<[1], [0], [0], [1], [0, 0, 1, 1], [], []>} : vector<8x128xbf16>, vector<128x256xbf16>, vector<8x256xf32> -> vector<8x256xf32>
    %3 = vector.shape_cast %2 : vector<8x256xf32> to vector<8x16x16xf32>
    %cst_3 = arith.constant dense<0.000000e+00> : vector<8x16xf32>
    %4 = vector.multi_reduction <add>, %3, %cst_3 [1] : vector<8x16x16xf32> to vector<8x16xf32>
    %5 = vector.shape_cast %4 : vector<8x16xf32> to vector<8x1x16xf32>
    %cst_4 = arith.constant 1.600000e+01 : f32
    %6 = vector.broadcast %cst_4 : f32 to vector<8x1x16xf32>
    %7 = arith.divf %5, %6 : vector<8x1x16xf32>
    %8 = arith.mulf %3, %3 : vector<8x16x16xf32>
    %cst_5 = arith.constant dense<0.000000e+00> : vector<8x16xf32>
    %9 = vector.multi_reduction <add>, %8, %cst_5 [1] : vector<8x16x16xf32> to vector<8x16xf32>
    %10 = vector.shape_cast %9 : vector<8x16xf32> to vector<8x1x16xf32>
    %cst_6 = arith.constant 1.600000e+01 : f32
    %11 = vector.broadcast %cst_6 : f32 to vector<8x1x16xf32>
    %12 = arith.divf %10, %11 : vector<8x1x16xf32>
    %13 = arith.mulf %7, %7 : vector<8x1x16xf32>
    %14 = arith.subf %12, %13 : vector<8x1x16xf32>
    %15 = vector.broadcast %7 : vector<8x1x16xf32> to vector<8x16x16xf32>
    %16 = arith.subf %3, %15 : vector<8x16x16xf32>
    %cst_7 = arith.constant 9.99999974E-6 : f32
    %17 = vector.broadcast %cst_7 : f32 to vector<8x1x16xf32>
    %18 = arith.addf %14, %17 : vector<8x1x16xf32>
    %19 = math.rsqrt %18 : vector<8x1x16xf32>
    %20 = vector.broadcast %19 : vector<8x1x16xf32> to vector<8x16x16xf32>
    %21 = arith.mulf %16, %20 : vector<8x16x16xf32>
    %c0_8 = arith.constant 0 : index
    %c0_9 = arith.constant 0 : index
    %22 = vector.load %arg3[%c0_8, %c0_9] : memref<1x16xf32, #tpu.memory_space<vmem>>, vector<1x16xf32>
    %23 = vector.shape_cast %22 : vector<1x16xf32> to vector<1x1x16xf32>
    %24 = vector.broadcast %23 : vector<1x1x16xf32> to vector<8x16x16xf32>
    %25 = arith.mulf %21, %24 : vector<8x16x16xf32>
    %c0_10 = arith.constant 0 : index
    %c0_11 = arith.constant 0 : index
    %26 = vector.load %arg4[%c0_10, %c0_11] : memref<1x16xf32, #tpu.memory_space<vmem>>, vector<1x16xf32>
    %27 = vector.shape_cast %26 : vector<1x16xf32> to vector<1x1x16xf32>
    %28 = vector.broadcast %27 : vector<1x1x16xf32> to vector<8x16x16xf32>
    %29 = arith.addf %25, %28 : vector<8x16x16xf32>
    %cst_12 = arith.constant 0.000000e+00 : f32
    %30 = vector.broadcast %cst_12 : f32 to vector<8x16x16xf32>
    %31 = arith.cmpf oge, %29, %30 : vector<8x16x16xf32>
    %cst_13 = arith.constant 2.000000e-01 : f32
    %32 = vector.broadcast %cst_13 : f32 to vector<8x16x16xf32>
    %33 = arith.mulf %32, %29 : vector<8x16x16xf32>
    %34 = arith.select %31, %29, %33 : vector<8x16x16xi1>, vector<8x16x16xf32>
    %35 = arith.truncf %34 : vector<8x16x16xf32> to vector<8x16x16xbf16>
    %c0_14 = arith.constant 0 : index
    %c0_15 = arith.constant 0 : index
    %c0_16 = arith.constant 0 : index
    %36 = vector.load %arg5[%c0_14, %c0_15, %c0_16] : memref<8x16x16xbf16, #tpu.memory_space<vmem>>, vector<8x16x16xbf16>
    tpu.vector_store %arg5[%c0_14, %c0_15, %c0_16], %35 {strides = array<i32>} : memref<8x16x16xbf16, #tpu.memory_space<vmem>>, vector<8x16x16xbf16>,
    return
  }
  func.func @transform_0(%arg0: i32) -> (i32, i32) {
    %c0_i32 = arith.constant 0 : i32
    %c0_i32_0 = arith.constant 0 : i32
    %c0_i32_1 = arith.constant 0 : i32
    return %c0_i32, %c0_i32_0 : i32, i32
  }
  func.func @transform_1(%arg0: i32) -> (i32, i32) {
    %c0_i32 = arith.constant 0 : i32
    %c0_i32_0 = arith.constant 0 : i32
    %c0_i32_1 = arith.constant 0 : i32
    return %c0_i32, %c0_i32_0 : i32, i32
  }
  func.func @transform_2(%arg0: i32) -> (i32, i32) {
    %c0_i32 = arith.constant 0 : i32
    %c0_i32_0 = arith.constant 0 : i32
    %c0_i32_1 = arith.constant 0 : i32
    return %c0_i32, %c0_i32_0 : i32, i32
  }
  func.func @transform_3(%arg0: i32) -> (i32, i32) {
    %c0_i32 = arith.constant 0 : i32
    %c0_i32_0 = arith.constant 0 : i32
    %c0_i32_1 = arith.constant 0 : i32
    return %c0_i32, %c0_i32_0 : i32, i32
  }
  func.func @transform_4(%arg0: i32) -> (i32, i32, i32) {
    %c0_i32 = arith.constant 0 : i32
    %c0_i32_0 = arith.constant 0 : i32
    %c0_i32_1 = arith.constant 0 : i32
    %c0_i32_2 = arith.constant 0 : i32
    return %c0_i32, %c0_i32_0, %c0_i32_1 : i32, i32, i32
  }
}

module attributes {stable_mosaic.version = 11 : i64} {
  func.func @tconv2x_bias_tanh_kernel(%arg0: i32, %arg1: memref<1x10x10x8xbf16, #tpu.memory_space<vmem>>, %arg2: memref<4x32x3xbf16, #tpu.memory_space<vmem>>, %arg3: memref<1x3xf32, #tpu.memory_space<vmem>>, %arg4: memref<1x8x2x8x6xf32, #tpu.memory_space<vmem>>) attributes {dimension_semantics = [#tpu.dimension_semantics<parallel>], iteration_bounds = array<i64: 2>, scalar_prefetch = 0 : i64, scratch_operands = 0 : i64, tpu.core_type = #tpu.core_type<tc>, window_params = [{transform_indices = @transform_0, window_bounds = array<i64: 1, 10, 10, 8>}, {pipeline_mode = #tpu.pipeline_mode<synchronous>, transform_indices = @transform_1, window_bounds = array<i64: 4, 32, 3>}, {pipeline_mode = #tpu.pipeline_mode<synchronous>, transform_indices = @transform_2, window_bounds = array<i64: 1, 3>}, {transform_indices = @transform_3, window_bounds = array<i64: 1, 8, 2, 8, 6>}]} {
    %c0 = arith.constant 0 : index
    %c0_0 = arith.constant 0 : index
    %c0_1 = arith.constant 0 : index
    %c0_2 = arith.constant 0 : index
    %0 = vector.load %arg1[%c0, %c0_0, %c0_1, %c0_2] : memref<1x10x10x8xbf16, #tpu.memory_space<vmem>>, vector<1x10x10x8xbf16>
    %1 = vector.shape_cast %0 : vector<1x10x10x8xbf16> to vector<10x10x8xbf16>
    %2 = vector.extract_strided_slice %1 {offsets = [0, 0, 0], sizes = [10, 8, 8], strides = [1, 1, 1]} : vector<10x10x8xbf16> to vector<10x8x8xbf16>
    %3 = vector.shape_cast %2 : vector<10x8x8xbf16> to vector<80x8xbf16>
    %4 = vector.extract_strided_slice %1 {offsets = [0, 1, 0], sizes = [10, 8, 8], strides = [1, 1, 1]} : vector<10x10x8xbf16> to vector<10x8x8xbf16>
    %5 = vector.shape_cast %4 : vector<10x8x8xbf16> to vector<80x8xbf16>
    %6 = vector.extract_strided_slice %1 {offsets = [0, 2, 0], sizes = [10, 8, 8], strides = [1, 1, 1]} : vector<10x10x8xbf16> to vector<10x8x8xbf16>
    %7 = vector.shape_cast %6 : vector<10x8x8xbf16> to vector<80x8xbf16>
    %8 = vector.extract_strided_slice %3 {offsets = [0, 0], sizes = [64, 8], strides = [1, 1]} : vector<80x8xbf16> to vector<64x8xbf16>
    %9 = vector.extract_strided_slice %5 {offsets = [0, 0], sizes = [64, 8], strides = [1, 1]} : vector<80x8xbf16> to vector<64x8xbf16>
    %10 = vector.extract_strided_slice %3 {offsets = [8, 0], sizes = [64, 8], strides = [1, 1]} : vector<80x8xbf16> to vector<64x8xbf16>
    %11 = vector.extract_strided_slice %5 {offsets = [8, 0], sizes = [64, 8], strides = [1, 1]} : vector<80x8xbf16> to vector<64x8xbf16>
    %12 = tpu.concatenate %8, %9, %10, %11 in 1 : vector<64x8xbf16>, vector<64x8xbf16>, vector<64x8xbf16>, vector<64x8xbf16> -> vector<64x32xbf16>
    %c0_3 = arith.constant 0 : index
    %c0_4 = arith.constant 0 : index
    %c0_5 = arith.constant 0 : index
    %13 = vector.load %arg2[%c0_3, %c0_4, %c0_5] : memref<4x32x3xbf16, #tpu.memory_space<vmem>>, vector<1x32x3xbf16>
    %14 = vector.shape_cast %13 : vector<1x32x3xbf16> to vector<32x3xbf16>
    %cst = arith.constant dense<0.000000e+00> : vector<64x3xf32>
    %15 = tpu.matmul %12, %14, %cst {dimension_numbers = #tpu.dot_dimension_numbers<[1], [0], [0], [1], [0, 0, 1, 1], [], []>} : vector<64x32xbf16>, vector<32x3xbf16>, vector<64x3xf32> -> vector<64x3xf32>
    %16 = vector.extract_strided_slice %5 {offsets = [0, 0], sizes = [64, 8], strides = [1, 1]} : vector<80x8xbf16> to vector<64x8xbf16>
    %17 = vector.extract_strided_slice %7 {offsets = [0, 0], sizes = [64, 8], strides = [1, 1]} : vector<80x8xbf16> to vector<64x8xbf16>
    %18 = vector.extract_strided_slice %5 {offsets = [8, 0], sizes = [64, 8], strides = [1, 1]} : vector<80x8xbf16> to vector<64x8xbf16>
    %19 = vector.extract_strided_slice %7 {offsets = [8, 0], sizes = [64, 8], strides = [1, 1]} : vector<80x8xbf16> to vector<64x8xbf16>
    %20 = tpu.concatenate %16, %17, %18, %19 in 1 : vector<64x8xbf16>, vector<64x8xbf16>, vector<64x8xbf16>, vector<64x8xbf16> -> vector<64x32xbf16>
    %c1 = arith.constant 1 : index
    %c0_6 = arith.constant 0 : index
    %c0_7 = arith.constant 0 : index
    %21 = vector.load %arg2[%c1, %c0_6, %c0_7] : memref<4x32x3xbf16, #tpu.memory_space<vmem>>, vector<1x32x3xbf16>
    %22 = vector.shape_cast %21 : vector<1x32x3xbf16> to vector<32x3xbf16>
    %cst_8 = arith.constant dense<0.000000e+00> : vector<64x3xf32>
    %23 = tpu.matmul %20, %22, %cst_8 {dimension_numbers = #tpu.dot_dimension_numbers<[1], [0], [0], [1], [0, 0, 1, 1], [], []>} : vector<64x32xbf16>, vector<32x3xbf16>, vector<64x3xf32> -> vector<64x3xf32>
    %24 = vector.extract_strided_slice %3 {offsets = [8, 0], sizes = [64, 8], strides = [1, 1]} : vector<80x8xbf16> to vector<64x8xbf16>
    %25 = vector.extract_strided_slice %5 {offsets = [8, 0], sizes = [64, 8], strides = [1, 1]} : vector<80x8xbf16> to vector<64x8xbf16>
    %26 = vector.extract_strided_slice %3 {offsets = [16, 0], sizes = [64, 8], strides = [1, 1]} : vector<80x8xbf16> to vector<64x8xbf16>
    %27 = vector.extract_strided_slice %5 {offsets = [16, 0], sizes = [64, 8], strides = [1, 1]} : vector<80x8xbf16> to vector<64x8xbf16>
    %28 = tpu.concatenate %24, %25, %26, %27 in 1 : vector<64x8xbf16>, vector<64x8xbf16>, vector<64x8xbf16>, vector<64x8xbf16> -> vector<64x32xbf16>
    %c2 = arith.constant 2 : index
    %c0_9 = arith.constant 0 : index
    %c0_10 = arith.constant 0 : index
    %29 = vector.load %arg2[%c2, %c0_9, %c0_10] : memref<4x32x3xbf16, #tpu.memory_space<vmem>>, vector<1x32x3xbf16>
    %30 = vector.shape_cast %29 : vector<1x32x3xbf16> to vector<32x3xbf16>
    %cst_11 = arith.constant dense<0.000000e+00> : vector<64x3xf32>
    %31 = tpu.matmul %28, %30, %cst_11 {dimension_numbers = #tpu.dot_dimension_numbers<[1], [0], [0], [1], [0, 0, 1, 1], [], []>} : vector<64x32xbf16>, vector<32x3xbf16>, vector<64x3xf32> -> vector<64x3xf32>
    %32 = vector.extract_strided_slice %5 {offsets = [8, 0], sizes = [64, 8], strides = [1, 1]} : vector<80x8xbf16> to vector<64x8xbf16>
    %33 = vector.extract_strided_slice %7 {offsets = [8, 0], sizes = [64, 8], strides = [1, 1]} : vector<80x8xbf16> to vector<64x8xbf16>
    %34 = vector.extract_strided_slice %5 {offsets = [16, 0], sizes = [64, 8], strides = [1, 1]} : vector<80x8xbf16> to vector<64x8xbf16>
    %35 = vector.extract_strided_slice %7 {offsets = [16, 0], sizes = [64, 8], strides = [1, 1]} : vector<80x8xbf16> to vector<64x8xbf16>
    %36 = tpu.concatenate %32, %33, %34, %35 in 1 : vector<64x8xbf16>, vector<64x8xbf16>, vector<64x8xbf16>, vector<64x8xbf16> -> vector<64x32xbf16>
    %c3 = arith.constant 3 : index
    %c0_12 = arith.constant 0 : index
    %c0_13 = arith.constant 0 : index
    %37 = vector.load %arg2[%c3, %c0_12, %c0_13] : memref<4x32x3xbf16, #tpu.memory_space<vmem>>, vector<1x32x3xbf16>
    %38 = vector.shape_cast %37 : vector<1x32x3xbf16> to vector<32x3xbf16>
    %cst_14 = arith.constant dense<0.000000e+00> : vector<64x3xf32>
    %39 = tpu.matmul %36, %38, %cst_14 {dimension_numbers = #tpu.dot_dimension_numbers<[1], [0], [0], [1], [0, 0, 1, 1], [], []>} : vector<64x32xbf16>, vector<32x3xbf16>, vector<64x3xf32> -> vector<64x3xf32>
    %c0_15 = arith.constant 0 : index
    %c0_16 = arith.constant 0 : index
    %40 = vector.load %arg3[%c0_15, %c0_16] : memref<1x3xf32, #tpu.memory_space<vmem>>, vector<1x3xf32>
    %41 = vector.broadcast %40 : vector<1x3xf32> to vector<64x3xf32>
    %42 = arith.addf %15, %41 : vector<64x3xf32>
    %43 = math.tanh %42 : vector<64x3xf32>
    %c0_17 = arith.constant 0 : index
    %c0_18 = arith.constant 0 : index
    %44 = vector.load %arg3[%c0_17, %c0_18] : memref<1x3xf32, #tpu.memory_space<vmem>>, vector<1x3xf32>
    %45 = vector.broadcast %44 : vector<1x3xf32> to vector<64x3xf32>
    %46 = arith.addf %23, %45 : vector<64x3xf32>
    %47 = math.tanh %46 : vector<64x3xf32>
    %c0_19 = arith.constant 0 : index
    %c0_20 = arith.constant 0 : index
    %48 = vector.load %arg3[%c0_19, %c0_20] : memref<1x3xf32, #tpu.memory_space<vmem>>, vector<1x3xf32>
    %49 = vector.broadcast %48 : vector<1x3xf32> to vector<64x3xf32>
    %50 = arith.addf %31, %49 : vector<64x3xf32>
    %51 = math.tanh %50 : vector<64x3xf32>
    %c0_21 = arith.constant 0 : index
    %c0_22 = arith.constant 0 : index
    %52 = vector.load %arg3[%c0_21, %c0_22] : memref<1x3xf32, #tpu.memory_space<vmem>>, vector<1x3xf32>
    %53 = vector.broadcast %52 : vector<1x3xf32> to vector<64x3xf32>
    %54 = arith.addf %39, %53 : vector<64x3xf32>
    %55 = math.tanh %54 : vector<64x3xf32>
    %56 = tpu.concatenate %43, %47 in 1 : vector<64x3xf32>, vector<64x3xf32> -> vector<64x6xf32>
    %57 = vector.shape_cast %56 : vector<64x6xf32> to vector<1x8x1x8x6xf32>
    %58 = tpu.concatenate %51, %55 in 1 : vector<64x3xf32>, vector<64x3xf32> -> vector<64x6xf32>
    %59 = vector.shape_cast %58 : vector<64x6xf32> to vector<1x8x1x8x6xf32>
    %60 = tpu.concatenate %57, %59 in 2 : vector<1x8x1x8x6xf32>, vector<1x8x1x8x6xf32> -> vector<1x8x2x8x6xf32>
    %c0_23 = arith.constant 0 : index
    %c0_24 = arith.constant 0 : index
    %c0_25 = arith.constant 0 : index
    %c0_26 = arith.constant 0 : index
    %c0_27 = arith.constant 0 : index
    %61 = vector.load %arg4[%c0_23, %c0_24, %c0_25, %c0_26, %c0_27] : memref<1x8x2x8x6xf32, #tpu.memory_space<vmem>>, vector<1x8x2x8x6xf32>
    tpu.vector_store %arg4[%c0_23, %c0_24, %c0_25, %c0_26, %c0_27], %60 {strides = array<i32>} : memref<1x8x2x8x6xf32, #tpu.memory_space<vmem>>, vector<1x8x2x8x6xf32>,
    return
  }
  func.func @transform_0(%arg0: i32) -> (i32, i32, i32, i32) {
    %c0_i32 = arith.constant 0 : i32
    %c0_i32_0 = arith.constant 0 : i32
    %c0_i32_1 = arith.constant 0 : i32
    %c0_i32_2 = arith.constant 0 : i32
    return %arg0, %c0_i32, %c0_i32_0, %c0_i32_1 : i32, i32, i32, i32
  }
  func.func @transform_1(%arg0: i32) -> (i32, i32, i32) {
    %c0_i32 = arith.constant 0 : i32
    %c0_i32_0 = arith.constant 0 : i32
    %c0_i32_1 = arith.constant 0 : i32
    %c0_i32_2 = arith.constant 0 : i32
    return %c0_i32, %c0_i32_0, %c0_i32_1 : i32, i32, i32
  }
  func.func @transform_2(%arg0: i32) -> (i32, i32) {
    %c0_i32 = arith.constant 0 : i32
    %c0_i32_0 = arith.constant 0 : i32
    %c0_i32_1 = arith.constant 0 : i32
    return %c0_i32, %c0_i32_0 : i32, i32
  }
  func.func @transform_3(%arg0: i32) -> (i32, i32, i32, i32, i32) {
    %c0_i32 = arith.constant 0 : i32
    %c0_i32_0 = arith.constant 0 : i32
    %c0_i32_1 = arith.constant 0 : i32
    %c0_i32_2 = arith.constant 0 : i32
    %c0_i32_3 = arith.constant 0 : i32
    return %arg0, %c0_i32, %c0_i32_0, %c0_i32_1, %c0_i32_2 : i32, i32, i32, i32, i32
  }
}

</mosaic_0001>

<bundles_post_ra>
// kernel: tconv_generator_forward.3
= control target key start
LH: loop header
LB: loop body
LE: loop exit
PB: predicated region body
PF: predicated region fallthrough
CT: control target
= control target key end

     0   :  { %v993_v1 = vmov 0   ;;  %s994_s23 = smov 80   ;;  %s995_s24 = smov 112   ;;  %v1001_v24 = vmov 1983009808   ;;  %v205_v26 = vlaneseq  ;;  %vm472_vm0 = vcmask 130048   ;;  %s1436_s1 = inlined_call_operand.vmem [shape: bf16[128,256], index: 1, kind: input, shape index: {}]   ;;  %s1437_s0 = inlined_call_operand.vmem [shape: bf16[8,128], index: 0, kind: input, shape index: {}]   ;;  %s1438_s2 = inlined_call_operand.vmem [shape: f32[1,16], index: 2, kind: input, shape index: {}]   ;;  %s1439_s3 = inlined_call_operand.vmem [shape: f32[1,16], index: 3, kind: input, shape index: {}]   ;;  %s1440_s4 = inlined_call_operand.vmem [shape: bf16[8,16,16], index: 4, kind: output, shape index: {}]  }
   0x1   :  { %v953_v0 = vld [vmem:[%s1436_s1 + $0x74] ss:$8 sps:$4 sm:$0xff]   ;;  %147 = vmatprep.mubr.bf16.mxu0 %v993_v1  ;;  %v955_v2 = vld [vmem:[%s1436_s1 + $0x70] ss:$8 sps:$4 sm:$0xff]   ;;  %v956_v3 = vld [vmem:[%s1436_s1 + $0x64] ss:$8 sps:$4 sm:$0xff]   ;;  %v203_v25 = vunpack.c.l.s4 %v1001_v24 }
   0x2   :  { %115 = vmatprep.subr.bf16.mxu0 %v953_v0  ;;  %v958_v4 = vld [vmem:[%s1436_s1 + $0x60] ss:$8 sps:$4 sm:$0xff]   ;;  %v959_v5 = vld [vmem:[%s1436_s1 + $0x54] ss:$8 sps:$4 sm:$0xff]   ;;  %v961_v6 = vld [vmem:[%s1436_s1 + $0x50] ss:$8 sps:$4 sm:$0xff]  }
   0x3   :  { %116 = vmatpush1.bf16.msra.mxu0 %v955_v2  ;;  %v962_v7 = vld [vmem:[%s1436_s1 + $0x44] ss:$8 sps:$4 sm:$0xff]   ;;  %v964_v8 = vld [vmem:[%s1436_s1 + $0x40] ss:$8 sps:$4 sm:$0xff]   ;;  %v965_v9 = vld [vmem:[%s1436_s1 + $0x34] ss:$8 sps:$4 sm:$0xff]   ;;  %v204_v29 = vunpack.c.0.s8 %v203_v25 }
   0x4   :  { %117 = vmatprep.subr.bf16.mxu0 %v956_v3  ;;  %v967_v10 = vld [vmem:[%s1436_s1 + $0x30] ss:$8 sps:$4 sm:$0xff]   ;;  %v968_v11 = vld [vmem:[%s1436_s1 + $0x24] ss:$8 sps:$4 sm:$0xff]   ;;  %v970_v12 = vld [vmem:[%s1436_s1 + $0x20] ss:$8 sps:$4 sm:$0xff]  }
   0x5   :  { %v971_v13 = vld [vmem:[%s1436_s1 + $0x14] ss:$8 sps:$4 sm:$0xff]   ;;  %v973_v14 = vld [vmem:[%s1436_s1 + $0x10] ss:$8 sps:$4 sm:$0xff]   ;;  %v974_v15 = vld [vmem:[%s1436_s1 + $0x4] ss:$8 sps:$4 sm:$0xff]  }
   0x6   :  { %v976_v16 = vld [vmem:[%s1436_s1] ss:$8 sps:$4 sm:$0xff]   ;;  %s996_s25 = smov 64   ;;  %s997_s26 = smov 96   ;;  %v206_v30 = vshrl.u32 %v205_v26, 7 }
   0x7   :  { %118 = vmatpush1.bf16.msra.mxu0 %v958_v4  ;;  %v18_v17 = vld [vmem:[%s1437_s0] sm:$0xf]  ;;  %s998_s1 = smov 32   ;;  %s999_s27 = smov 48   ;;  %v1002_v31 = vmov 1934713408  }
   0x8   :  { %119 = vmatprep.subr.bf16.mxu0 %v959_v5  ;;  %s1000_s28 = smov 16   ;;  %v267_v32 = vunpack.c.l.s4 %v1002_v31  ;;  %v1088_v39 = vsub.s32 %v204_v29, %v206_v30 }
   0xa   :  { %v268_v42 = vunpack.c.0.s8 %v267_v32 }
   0xb   :  { %120 = vmatpush1.bf16.msra.mxu0 %v961_v6 }
   0xc   :  { %121 = vmatprep.subr.bf16.mxu0 %v962_v7  ;;  %v1098_v55 = vsub.s32 %v268_v42, %v206_v30 }
   0xf   :  { %122 = vmatpush1.bf16.msra.mxu0 %v964_v8 }
  0x10   :  { %123 = vmatprep.subr.bf16.mxu0 %v965_v9 }
  0x13   :  { %124 = vmatpush1.bf16.msra.mxu0 %v967_v10 }
  0x14   :  { %125 = vmatprep.subr.bf16.mxu0 %v968_v11 }
  0x17   :  { %126 = vmatpush1.bf16.msra.mxu0 %v970_v12 }
  0x18   :  { %127 = vmatprep.subr.bf16.mxu0 %v971_v13 }
  0x1b   :  { %128 = vmatpush1.bf16.msra.mxu0 %v973_v14 }
  0x1c   :  { %129 = vmatprep.subr.bf16.mxu0 %v974_v15 }
  0x1f   :  { %130 = vmatpush1.bf16.msra.mxu0 %v976_v16 }
  0x22   :  { %148 = vmatmul.mubr.bf16.vlgmr.msra.gmra.mxu0 %v18_v17 }
  0xe2   :  { %v149_v18 = vpop.f32.mrf.mxu0 }
  0xe3   :  { %163 = vrot.lane.b32.xlu1 %v149_v18, %s994_s23  ;;  %157 = vrot.lane.b32.xlu0 %v149_v18, %s995_s24 }
  0xe4   :  { %v1079_v19 = vpop.f32.mrf.mxu0 }
  0xe6   :  { %v153_v20 = vpop.f32.mrf.mxu0 }
  0xe7   :  { %166 = vrot.lane.b32.xlu1 %v149_v18, %s996_s25  ;;  %160 = vrot.lane.b32.xlu0 %v149_v18, %s997_s26 }
  0xe8   :  { %v154_v21 = vpop.f32.mrf.mxu0 }
  0xeb   :  { %172 = vrot.lane.b32.xlu1 %v149_v18, %s998_s1  ;;  %169 = vrot.lane.b32.xlu0 %v149_v18, %s999_s27 }
  0xef   :  { %175 = vrot.lane.b32.xlu0 %v149_v18, %s1000_s28  ;;  %179 = vrot.lane.b32.xlu1 %v1079_v19, %s995_s24 }
  0xf3   :  { %182 = vrot.lane.b32.xlu0 %v1079_v19, %s997_s26  ;;  %185 = vrot.lane.b32.xlu1 %v1079_v19, %s994_s23 }
  0xf7   :  { %188 = vrot.lane.b32.xlu0 %v1079_v19, %s996_s25  ;;  %191 = vrot.lane.b32.xlu1 %v1079_v19, %s999_s27 }
  0xfb   :  { %194 = vrot.lane.b32.xlu0 %v1079_v19, %s998_s1  ;;  %197 = vrot.lane.b32.xlu1 %v1079_v19, %s1000_s28 }
 0x155   :  { %v164_v22 = vpop.permute.xlu1 %163  ;;  %v158_v23 = vpop.permute.xlu0 %157 }
 0x156   :  { %v216_v40 = vcombine.low %v158_v23, %v164_v22  ;;  %v217_v41 = vcombine.high %v158_v23, %v164_v22 }
 0x158   :  { %v224_v53 = vrot.slane %v216_v40, %v1088_v39  ;;  %v231_v54 = vrot.slane %v217_v41, %v1088_v39 }
 0x159   :  { %v167_v27 = vpop.permute.xlu1 %166  ;;  %v161_v28 = vpop.permute.xlu0 %160 }
 0x15a   :  { %v200_v35 = vcombine.low %v149_v18, %v161_v28  ;;  %v201_v36 = vcombine.high %v149_v18, %v161_v28 }
 0x15c   :  { %v208_v47 = vrot.slane %v200_v35, %v1088_v39  ;;  %v215_v48 = vrot.slane %v201_v36, %v1088_v39 }
 0x15d   :  { %v173_v33 = vpop.permute.xlu1 %172  ;;  %v170_v34 = vpop.permute.xlu0 %169 }
 0x15e   :  { %v232_v37 = vcombine.low %v167_v27, %v173_v33  ;;  %v233_v38 = vcombine.high %v167_v27, %v173_v33  ;;  %v264_v62 = vcombine.low %v208_v47, %v224_v53  ;;  %v265_v63 = vcombine.high %v208_v47, %v224_v53 }
 0x15f   :  { %v280_v0 = vcombine.low %v215_v48, %v231_v54  ;;  %v281_v1 = vcombine.high %v215_v48, %v231_v54 }
 0x160   :  { %v240_v49 = vrot.slane %v232_v37, %v1088_v39  ;;  %v247_v50 = vrot.slane %v233_v38, %v1088_v39  ;;  %v272_v8 = vrot.slane %v264_v62, %v1098_v55  ;;  %v279_v9 = vrot.slane %v265_v63, %v1098_v55 }
 0x161   :  { %v176_v43 = vpop.permute.xlu0 %175  ;;  %v180_v44 = vpop.permute.xlu1 %179  ;;  %v288_v10 = vrot.slane %v280_v0, %v1098_v55  ;;  %v295_v11 = vrot.slane %v281_v1, %v1098_v55 }
 0x162   :  { %v248_v45 = vcombine.low %v170_v34, %v176_v43  ;;  %v249_v46 = vcombine.high %v170_v34, %v176_v43 }
 0x164   :  { %v256_v51 = vrot.slane %v248_v45, %v1088_v39  ;;  %v263_v52 = vrot.slane %v249_v46, %v1088_v39 }
 0x165   :  { %v183_v56 = vpop.permute.xlu0 %182  ;;  %v186_v57 = vpop.permute.xlu1 %185 }
 0x166   :  { %v296_v58 = vcombine.low %v240_v49, %v256_v51  ;;  %v297_v59 = vcombine.high %v240_v49, %v256_v51  ;;  %v312_v60 = vcombine.low %v247_v50, %v263_v52  ;;  %v313_v61 = vcombine.high %v247_v50, %v263_v52 }
 0x167   :  { %v336_v12 = vcombine.low %v1079_v19, %v183_v56  ;;  %v337_v13 = vcombine.high %v1079_v19, %v183_v56  ;;  %v352_v14 = vcombine.low %v180_v44, %v186_v57  ;;  %v353_v15 = vcombine.high %v180_v44, %v186_v57 }
 0x168   :  { %v304_v2 = vrot.slane %v296_v58, %v1098_v55  ;;  %v311_v3 = vrot.slane %v297_v59, %v1098_v55  ;;  %v320_v4 = vrot.slane %v312_v60, %v1098_v55  ;;  %v327_v5 = vrot.slane %v313_v61, %v1098_v55 }
 0x169   :  { %v189_v6 = vpop.permute.xlu0 %188  ;;  %v192_v7 = vpop.permute.xlu1 %191  ;;  %v344_v19 = vrot.slane %v336_v12, %v1088_v39  ;;  %v351_v25 = vrot.slane %v337_v13, %v1088_v39  ;;  %v360_v26 = vrot.slane %v352_v14, %v1088_v39  ;;  %v367_v27 = vrot.slane %v353_v15, %v1088_v39 }
 0x16a   :  { %v1110_v16 = vcombine.low %v272_v8, %v304_v2  ;;  %v1112_v17 = vcombine.high %v272_v8, %v304_v2  ;;  %v1114_v18 = vcombine.low %v279_v9, %v311_v3  ;;  %v1116_v20 = vcombine.high %v279_v9, %v311_v3 }
 0x16b   :  { %v1118_v21 = vcombine.low %v288_v10, %v320_v4  ;;  %v1120_v22 = vcombine.high %v288_v10, %v320_v4  ;;  %v1122_v23 = vcombine.low %v295_v11, %v327_v5  ;;  %v1124_v24 = vcombine.high %v295_v11, %v327_v5 }
 0x16c   :  { %v473_v30 = vsel %vm472_vm0, %v1110_v16, 0.0  ;;  %v482_v31 = vsel %vm472_vm0, %v1112_v17, 0.0  ;;  %v491_v32 = vsel %vm472_vm0, %v1114_v18, 0.0  ;;  %v500_v33 = vsel %vm472_vm0, %v1116_v20, 0.0 }
 0x16d   :  { %v195_v28 = vpop.permute.xlu0 %194  ;;  %v198_v29 = vpop.permute.xlu1 %197  ;;  %v509_v34 = vsel %vm472_vm0, %v1118_v21, 0.0  ;;  %v518_v35 = vsel %vm472_vm0, %v1120_v22, 0.0  ;;  %v527_v36 = vsel %vm472_vm0, %v1122_v23, 0.0  ;;  %v536_v37 = vsel %vm472_vm0, %v1124_v24, 0.0 }
 0x16e   :  { %v368_v38 = vcombine.low %v189_v6, %v195_v28  ;;  %v369_v40 = vcombine.high %v189_v6, %v195_v28  ;;  %v384_v41 = vcombine.low %v192_v7, %v198_v29  ;;  %v385_v42 = vcombine.high %v192_v7, %v198_v29 }
 0x16f   :  { %v1148_v43 = vmul.f32 %v1110_v16, %v1110_v16  ;;  %v1152_v44 = vmul.f32 %v1112_v17, %v1112_v17  ;;  %v400_v45 = vcombine.low %v344_v19, %v360_v26  ;;  %v401_v46 = vcombine.high %v344_v19, %v360_v26 }
 0x170   :  { %v376_v47 = vrot.slane %v368_v38, %v1088_v39  ;;  %v383_v48 = vrot.slane %v369_v40, %v1088_v39  ;;  %v392_v49 = vrot.slane %v384_v41, %v1088_v39  ;;  %v399_v50 = vrot.slane %v385_v42, %v1088_v39 }
 0x171   :  { %v1160_v51 = vmul.f32 %v1114_v18, %v1114_v18  ;;  %v1164_v52 = vmul.f32 %v1116_v20, %v1116_v20  ;;  %v416_v53 = vcombine.low %v351_v25, %v367_v27  ;;  %v417_v54 = vcombine.high %v351_v25, %v367_v27 }
 0x172   :  { %v432_v56 = vcombine.low %v376_v47, %v392_v49  ;;  %v433_v57 = vcombine.high %v376_v47, %v392_v49  ;;  %v448_v58 = vcombine.low %v383_v48, %v399_v50  ;;  %v449_v59 = vcombine.high %v383_v48, %v399_v50 }
 0x173   :  { %v1168_v60 = vmul.f32 %v1118_v21, %v1118_v21  ;;  %v1172_v39 = vmul.f32 %v1120_v22, %v1120_v22  ;;  %v408_v61 = vrot.slane %v400_v45, %v1098_v55  ;;  %v415_v62 = vrot.slane %v401_v46, %v1098_v55 }
 0x174   :  { %v440_v63 = vrot.slane %v432_v56, %v1098_v55  ;;  %v447_v0 = vrot.slane %v433_v57, %v1098_v55  ;;  %v456_v1 = vrot.slane %v448_v58, %v1098_v55  ;;  %v463_v2 = vrot.slane %v449_v59, %v1098_v55 }
 0x175   :  { %v1182_v3 = vmul.f32 %v1122_v23, %v1122_v23  ;;  %v1186_v4 = vmul.f32 %v1124_v24, %v1124_v24  ;;  %v424_v5 = vrot.slane %v416_v53, %v1098_v55  ;;  %v431_v6 = vrot.slane %v417_v54, %v1098_v55 }
 0x176   :  { %v1190_v7 = vcombine.low %v408_v61, %v440_v63  ;;  %v1192_v8 = vcombine.high %v408_v61, %v440_v63  ;;  %v1194_v9 = vcombine.low %v415_v62, %v447_v0  ;;  %v1196_v10 = vcombine.high %v415_v62, %v447_v0 }
 0x177   :  { %v1198_v11 = vcombine.low %v424_v5, %v456_v1  ;;  %v1200_v12 = vcombine.high %v424_v5, %v456_v1  ;;  %v1202_v13 = vcombine.low %v431_v6, %v463_v2  ;;  %v1204_v14 = vcombine.high %v431_v6, %v463_v2 }
 0x178   :  { %v474_v15 = vsel %vm472_vm0, %v1190_v7, 0.0  ;;  %v483_v55 = vsel %vm472_vm0, %v1192_v8, 0.0  ;;  %v492_v19 = vsel %vm472_vm0, %v1194_v9, 0.0  ;;  %v501_v25 = vsel %vm472_vm0, %v1196_v10, 0.0 }
 0x179   :  { %v475_v26 = vadd.f32 %v474_v15, %v473_v30  ;;  %v484_v27 = vadd.f32 %v483_v55, %v482_v31  ;;  %v493_v28 = vadd.f32 %v492_v19, %v491_v32  ;;  %v502_v29 = vadd.f32 %v501_v25, %v500_v33 }
 0x17a   :  { %v510_v38 = vsel %vm472_vm0, %v1198_v11, 0.0  ;;  %v519_v40 = vsel %vm472_vm0, %v1200_v12, 0.0  ;;  %v528_v41 = vsel %vm472_vm0, %v1202_v13, 0.0  ;;  %v537_v42 = vsel %vm472_vm0, %v1204_v14, 0.0 }
 0x17b   :  { %v476_v45 = vrot.slane %v475_v26, 4  ;;  %v485_v46 = vrot.slane %v484_v27, 4  ;;  %v494_v47 = vrot.slane %v493_v28, 4  ;;  %v503_v48 = vrot.slane %v502_v29, 4 }
 0x17c   :  { %v511_v30 = vadd.f32 %v510_v38, %v509_v34  ;;  %v520_v31 = vadd.f32 %v519_v40, %v518_v35  ;;  %v529_v32 = vadd.f32 %v528_v41, %v527_v36  ;;  %v538_v33 = vadd.f32 %v537_v42, %v536_v37 }
 0x17d   :  { %v477_v49 = vadd.f32 %v476_v45, %v475_v26  ;;  %v486_v50 = vadd.f32 %v485_v46, %v484_v27  ;;  %v495_v53 = vadd.f32 %v494_v47, %v493_v28  ;;  %v504_v54 = vadd.f32 %v503_v48, %v502_v29 }
 0x17e   :  { %v512_v56 = vrot.slane %v511_v30, 4  ;;  %v521_v57 = vrot.slane %v520_v31, 4  ;;  %v530_v58 = vrot.slane %v529_v32, 4  ;;  %v539_v59 = vrot.slane %v538_v33, 4 }
 0x17f   :  { %v478_v61 = vrot.slane %v477_v49, 2  ;;  %v487_v62 = vrot.slane %v486_v50, 2  ;;  %v496_v63 = vrot.slane %v495_v53, 2  ;;  %v505_v0 = vrot.slane %v504_v54, 2 }
 0x180   :  { %v513_v1 = vadd.f32 %v512_v56, %v511_v30  ;;  %v522_v2 = vadd.f32 %v521_v57, %v520_v31  ;;  %v531_v5 = vadd.f32 %v530_v58, %v529_v32  ;;  %v540_v6 = vadd.f32 %v539_v59, %v538_v33 }
 0x181   :  { %v479_v34 = vadd.f32 %v478_v61, %v477_v49  ;;  %v488_v35 = vadd.f32 %v487_v62, %v486_v50  ;;  %v497_v36 = vadd.f32 %v496_v63, %v495_v53  ;;  %v506_v37 = vadd.f32 %v505_v0, %v504_v54 }
 0x182   :  { %v514_v15 = vrot.slane %v513_v1, 2  ;;  %v523_v55 = vrot.slane %v522_v2, 2  ;;  %v532_v19 = vrot.slane %v531_v5, 2  ;;  %v541_v25 = vrot.slane %v540_v6, 2 }
 0x183   :  { %v480_v26 = vrot.slane %v479_v34, 1  ;;  %v489_v27 = vrot.slane %v488_v35, 1  ;;  %v498_v28 = vrot.slane %v497_v36, 1  ;;  %v507_v29 = vrot.slane %v506_v37, 1 }
 0x184   :  { %v515_v38 = vadd.f32 %v514_v15, %v513_v1  ;;  %v524_v40 = vadd.f32 %v523_v55, %v522_v2  ;;  %v533_v41 = vadd.f32 %v532_v19, %v531_v5  ;;  %v1222_v42 = vadd.f32 %v541_v25, %v540_v6 }
 0x185   :  { %v570_v45 = vsel %vm472_vm0, %v1148_v43, 0.0  ;;  %v579_v46 = vsel %vm472_vm0, %v1152_v44, 0.0  ;;  %v588_v47 = vsel %vm472_vm0, %v1160_v51, 0.0  ;;  %v597_v48 = vsel %vm472_vm0, %v1164_v52, 0.0 }
 0x186   :  { %v481_v30 = vadd.f32 %v480_v26, %v479_v34  ;;  %v516_v31 = vrot.slane %v515_v38, 1  ;;  %v525_v32 = vrot.slane %v524_v40, 1  ;;  %v534_v33 = vrot.slane %v533_v41, 1 }
 0x187   :  { %v606_v49 = vsel %vm472_vm0, %v1168_v60, 0.0  ;;  %v615_v50 = vsel %vm472_vm0, %v1172_v39, 0.0  ;;  %v624_v43 = vsel %vm472_vm0, %v1182_v3, 0.0  ;;  %v633_v44 = vsel %vm472_vm0, %v1186_v4, 0.0 }
 0x188   :  { %v1240_v51 = vadd.f32 %v489_v27, %v488_v35  ;;  %v1242_v53 = vadd.f32 %v498_v28, %v497_v36  ;;  %v1244_v52 = vadd.f32 %v507_v29, %v506_v37  ;;  %v543_v54 = vrot.slane %v1222_v42, 1 }
 0x189   :  { %v555_v60 = vmul.f32 %v1190_v7, %v1190_v7  ;;  %v557_v39 = vmul.f32 %v1192_v8, %v1192_v8  ;;  %v559_v3 = vmul.f32 %v1194_v9, %v1194_v9  ;;  %v561_v4 = vmul.f32 %v1196_v10, %v1196_v10 }
 0x18a   :  { %v1255_v56 = vadd.f32 %v516_v31, %v515_v38  ;;  %v1257_v57 = vadd.f32 %v525_v32, %v524_v40  ;;  %v1259_v58 = vadd.f32 %v534_v33, %v533_v41  ;;  %v1261_v59 = vmul.f32 0.0625, %v481_v30 }
 0x18b   :  { %v563_v61 = vmul.f32 %v1198_v11, %v1198_v11  ;;  %v565_v62 = vmul.f32 %v1200_v12, %v1200_v12  ;;  %v567_v63 = vmul.f32 %v1202_v13, %v1202_v13  ;;  %v569_v0 = vmul.f32 %v1204_v14, %v1204_v14 }
 0x18c   :  { %v571_v1 = vsel %vm472_vm0, %v555_v60, 0.0  ;;  %v580_v2 = vsel %vm472_vm0, %v557_v39, 0.0  ;;  %v589_v5 = vsel %vm472_vm0, %v559_v3, 0.0  ;;  %v598_v6 = vsel %vm472_vm0, %v561_v4, 0.0 }
 0x18d   :  { %v572_v34 = vadd.f32 %v571_v1, %v570_v45  ;;  %v581_v35 = vadd.f32 %v580_v2, %v579_v46  ;;  %v590_v36 = vadd.f32 %v589_v5, %v588_v47  ;;  %v599_v37 = vadd.f32 %v598_v6, %v597_v48 }
 0x18e   :  { %v607_v15 = vsel %vm472_vm0, %v563_v61, 0.0  ;;  %v616_v55 = vsel %vm472_vm0, %v565_v62, 0.0  ;;  %v625_v19 = vsel %vm472_vm0, %v567_v63, 0.0  ;;  %v634_v25 = vsel %vm472_vm0, %v569_v0, 0.0 }
 0x18f   :  { %v573_v26 = vrot.slane %v572_v34, 4  ;;  %v582_v27 = vrot.slane %v581_v35, 4  ;;  %v591_v28 = vrot.slane %v590_v36, 4  ;;  %v600_v29 = vrot.slane %v599_v37, 4 }
 0x190   :  { %v608_v38 = vadd.f32 %v607_v15, %v606_v49  ;;  %v617_v40 = vadd.f32 %v616_v55, %v615_v50  ;;  %v626_v41 = vadd.f32 %v625_v19, %v624_v43  ;;  %v635_v30 = vadd.f32 %v634_v25, %v633_v44 }
 0x191   :  { %v574_v45 = vadd.f32 %v573_v26, %v572_v34  ;;  %v583_v46 = vadd.f32 %v582_v27, %v581_v35  ;;  %v592_v47 = vadd.f32 %v591_v28, %v590_v36  ;;  %v601_v48 = vadd.f32 %v600_v29, %v599_v37 }
 0x192   :  { %v609_v31 = vrot.slane %v608_v38, 4  ;;  %v618_v32 = vrot.slane %v617_v40, 4  ;;  %v627_v33 = vrot.slane %v626_v41, 4  ;;  %v636_v60 = vrot.slane %v635_v30, 4 }
 0x193   :  { %v575_v39 = vrot.slane %v574_v45, 2  ;;  %v584_v3 = vrot.slane %v583_v46, 2  ;;  %v593_v4 = vrot.slane %v592_v47, 2  ;;  %v602_v61 = vrot.slane %v601_v48, 2 }
 0x194   :  { %v610_v62 = vadd.f32 %v609_v31, %v608_v38  ;;  %v619_v63 = vadd.f32 %v618_v32, %v617_v40  ;;  %v628_v0 = vadd.f32 %v627_v33, %v626_v41  ;;  %v637_v1 = vadd.f32 %v636_v60, %v635_v30 }
 0x195   :  { %v576_v49 = vadd.f32 %v575_v39, %v574_v45  ;;  %v585_v50 = vadd.f32 %v584_v3, %v583_v46  ;;  %v594_v43 = vadd.f32 %v593_v4, %v592_v47  ;;  %v603_v44 = vadd.f32 %v602_v61, %v601_v48 }
 0x196   :  { %v611_v2 = vrot.slane %v610_v62, 2  ;;  %v620_v5 = vrot.slane %v619_v63, 2  ;;  %v629_v6 = vrot.slane %v628_v0, 2  ;;  %v638_v34 = vrot.slane %v637_v1, 2 }
 0x197   :  { %v577_v35 = vrot.slane %v576_v49, 1  ;;  %v586_v36 = vrot.slane %v585_v50, 1  ;;  %v595_v37 = vrot.slane %v594_v43, 1  ;;  %v604_v15 = vrot.slane %v603_v44, 1 }
 0x198   :  { %v612_v55 = vadd.f32 %v611_v2, %v610_v62  ;;  %v621_v19 = vadd.f32 %v620_v5, %v619_v63  ;;  %v630_v25 = vadd.f32 %v629_v6, %v628_v0  ;;  %v639_v26 = vadd.f32 %v638_v34, %v637_v1 }
 0x199   :  { %v1280_v27 = vmul.f32 0.0625, %v1240_v51  ;;  %v1283_v28 = vmul.f32 0.0625, %v1242_v53  ;;  %v578_v29 = vadd.f32 %v577_v35, %v576_v49  ;;  %v587_v38 = vadd.f32 %v586_v36, %v585_v50 }
 0x19a   :  { %v596_v40 = vadd.f32 %v595_v37, %v594_v43  ;;  %v613_v41 = vrot.slane %v612_v55, 1  ;;  %v622_v30 = vrot.slane %v621_v19, 1  ;;  %v631_v45 = vrot.slane %v630_v25, 1 }
 0x19b   :  { %v544_v46 = vadd.f32 %v543_v54, %v1222_v42  ;;  %v1289_v47 = vmul.f32 0.0625, %v1244_v52  ;;  %v605_v48 = vadd.f32 %v604_v15, %v603_v44  ;;  %v640_v31 = vrot.slane %v639_v26, 1 }
 0x19c   :  { %v1292_v51 = vmul.f32 0.0625, %v1255_v56  ;;  %v1295_v53 = vmul.f32 0.0625, %v1257_v57  ;;  %v1298_v32 = vmul.f32 0.0625, %v1259_v58  ;;  %v614_v33 = vadd.f32 %v613_v41, %v612_v55 }
 0x19d   :  { %v623_v60 = vadd.f32 %v622_v30, %v621_v19  ;;  %v632_v39 = vadd.f32 %v631_v45, %v630_v25  ;;  %v642_v3 = vmul.f32 0.0625, %v578_v29  ;;  %v643_v4 = vmul.f32 0.0625, %v587_v38 }
 0x19e   :  { %v644_v42 = vmul.f32 0.0625, %v596_v40  ;;  %v650_v52 = vmul.f32 %v1261_v59, %v1261_v59  ;;  %v651_v54 = vmul.f32 %v1280_v27, %v1280_v27  ;;  %v652_v56 = vmul.f32 %v1283_v28, %v1283_v28 }
 0x19f   :  { %v1306_v57 = vmul.f32 0.0625, %v544_v46  ;;  %v641_v61 = vadd.f32 %v640_v31, %v639_v26  ;;  %v645_v58 = vmul.f32 0.0625, %v605_v48  ;;  %v653_v62 = vmul.f32 %v1289_v47, %v1289_v47 }
 0x1a0   :  { %v646_v63 = vmul.f32 0.0625, %v614_v33  ;;  %v654_v0 = vmul.f32 %v1292_v51, %v1292_v51  ;;  %v647_v1 = vmul.f32 0.0625, %v623_v60  ;;  %v648_v49 = vmul.f32 0.0625, %v632_v39 }
 0x1a1   :  { %v655_v50 = vmul.f32 %v1295_v53, %v1295_v53  ;;  %v656_v43 = vmul.f32 %v1298_v32, %v1298_v32  ;;  %v658_v44 = vsub.f32 %v642_v3, %v650_v52  ;;  %v659_v2 = vsub.f32 %v643_v4, %v651_v54 }
 0x1a2   :  { %v660_v5 = vsub.f32 %v644_v42, %v652_v56  ;;  %v649_v6 = vmul.f32 0.0625, %v641_v61  ;;  %v657_v34 = vmul.f32 %v1306_v57, %v1306_v57  ;;  %v661_v35 = vsub.f32 %v645_v58, %v653_v62 }
 0x1a3   :  { %v662_v36 = vsub.f32 %v646_v63, %v654_v0  ;;  %v663_v37 = vsub.f32 %v647_v1, %v655_v50  ;;  %v664_v15 = vsub.f32 %v648_v49, %v656_v43  ;;  %v682_v55 = vadd.f32 1e-05, %v658_v44 }
 0x1a4   :  { %v683_v19 = vadd.f32 1e-05, %v659_v2  ;;  %v684_v25 = vadd.f32 1e-05, %v660_v5  ;;  %v665_v26 = vsub.f32 %v649_v6, %v657_v34  ;;  %v685_v29 = vadd.f32 1e-05, %v661_v35 }
 0x1a5   :  { %v686_v38 = vadd.f32 1e-05, %v662_v36  ;;  %977 = vrsqrt.f32 %v682_v55  ;;  %v687_v40 = vadd.f32 1e-05, %v663_v37  ;;  %v688_v41 = vadd.f32 1e-05, %v664_v15 }
 0x1a6   :  { %979 = vrsqrt.f32 %v683_v19  ;;  %v689_v30 = vadd.f32 1e-05, %v665_v26  ;;  %v666_v45 = vsub.f32 %v1110_v16, %v1261_v59  ;;  %v667_v46 = vsub.f32 %v1190_v7, %v1261_v59 }
 0x1a7   :  { %981 = vrsqrt.f32 %v684_v25  ;;  %v668_v48 = vsub.f32 %v1112_v17, %v1280_v27  ;;  %v669_v31 = vsub.f32 %v1192_v8, %v1280_v27  ;;  %v670_v33 = vsub.f32 %v1114_v18, %v1283_v28  ;;  %v909_v17 = vld [vmem:[%s1438_s2] ss:$0 sm:$0xff] }
 0x1a8   :  { %983 = vrsqrt.f32 %v685_v29  ;;  %v671_v60 = vsub.f32 %v1194_v9, %v1283_v28  ;;  %v672_v39 = vsub.f32 %v1116_v20, %v1289_v47  ;;  %v673_v16 = vsub.f32 %v1196_v10, %v1289_v47 }
 0x1a9   :  { %985 = vrsqrt.f32 %v686_v38  ;;  %v674_v7 = vsub.f32 %v1118_v21, %v1292_v51  ;;  %v675_v18 = vsub.f32 %v1198_v11, %v1292_v51  ;;  %v676_v8 = vsub.f32 %v1120_v22, %v1295_v53 }
 0x1aa   :  { %987 = vrsqrt.f32 %v687_v40  ;;  %v677_v20 = vsub.f32 %v1200_v12, %v1295_v53  ;;  %v678_v10 = vsub.f32 %v1122_v23, %v1298_v32  ;;  %v679_v59 = vsub.f32 %v1202_v13, %v1298_v32 }
 0x1ab   :  { %989 = vrsqrt.f32 %v688_v41  ;;  %v680_v21 = vsub.f32 %v1124_v24, %v1306_v57  ;;  %v681_v11 = vsub.f32 %v1204_v14, %v1306_v57  ;;  %v910_v14 = vld [vmem:[%s1439_s3] ss:$0 sm:$0xff] }
 0x1ac   :  { %991 = vrsqrt.f32 %v689_v30 }
 0x1b2   :  { %v978_v3 = vpop.eup %977 }
 0x1b3   :  { %v980_v9 = vpop.eup %979  ;;  %v698_v27 = vmul.f32 %v978_v3, %v666_v45  ;;  %v699_v28 = vmul.f32 %v978_v3, %v667_v46 }
 0x1b4   :  { %v982_v47 = vpop.eup %981  ;;  %v700_v22 = vmul.f32 %v980_v9, %v668_v48  ;;  %v701_v51 = vmul.f32 %v980_v9, %v669_v31 }
 0x1b5   :  { %v984_v4 = vpop.eup %983  ;;  %v702_v12 = vmul.f32 %v982_v47, %v670_v33  ;;  %v703_v53 = vmul.f32 %v982_v47, %v671_v60  ;;  %v721_v42 = vmul.f32 %v909_v17, %v698_v27  ;;  %v722_v52 = vmul.f32 %v909_v17, %v699_v28 }
 0x1b6   :  { %v986_v23 = vpop.eup %985  ;;  %v704_v54 = vmul.f32 %v984_v4, %v672_v39  ;;  %v705_v56 = vmul.f32 %v984_v4, %v673_v16  ;;  %v723_v13 = vmul.f32 %v909_v17, %v700_v22  ;;  %v724_v32 = vmul.f32 %v909_v17, %v701_v51 }
 0x1b7   :  { %v988_v61 = vpop.eup %987  ;;  %v706_v58 = vmul.f32 %v986_v23, %v674_v7  ;;  %v707_v62 = vmul.f32 %v986_v23, %v675_v18  ;;  %v725_v63 = vmul.f32 %v909_v17, %v702_v12  ;;  %v726_v24 = vmul.f32 %v909_v17, %v703_v53 }
 0x1b8   :  { %v990_v0 = vpop.eup %989  ;;  %v708_v57 = vmul.f32 %v988_v61, %v676_v8  ;;  %v709_v1 = vmul.f32 %v988_v61, %v677_v20  ;;  %v727_v49 = vmul.f32 %v909_v17, %v704_v54  ;;  %v728_v50 = vmul.f32 %v909_v17, %v705_v56 }
 0x1b9   :  { %v992_v43 = vpop.eup %991  ;;  %v710_v44 = vmul.f32 %v990_v0, %v678_v10  ;;  %v711_v2 = vmul.f32 %v990_v0, %v679_v59  ;;  %v729_v5 = vmul.f32 %v909_v17, %v706_v58  ;;  %v730_v6 = vmul.f32 %v909_v17, %v707_v62 }
 0x1ba   :  { %v712_v34 = vmul.f32 %v992_v43, %v680_v21  ;;  %v713_v35 = vmul.f32 %v992_v43, %v681_v11  ;;  %v731_v36 = vmul.f32 %v909_v17, %v708_v57  ;;  %v732_v37 = vmul.f32 %v909_v17, %v709_v1 }
 0x1bb   :  { %v733_v15 = vmul.f32 %v909_v17, %v710_v44  ;;  %v734_v55 = vmul.f32 %v909_v17, %v711_v2  ;;  %v744_v19 = vadd.f32 %v910_v14, %v721_v42  ;;  %v745_v25 = vadd.f32 %v910_v14, %v722_v52 }
 0x1bc   :  { %v735_v26 = vmul.f32 %v909_v17, %v712_v34  ;;  %v736_v29 = vmul.f32 %v909_v17, %v713_v35  ;;  %v746_v38 = vadd.f32 %v910_v14, %v723_v13  ;;  %v747_v40 = vadd.f32 %v910_v14, %v724_v32 }
 0x1bd   :  { %v748_v41 = vadd.f32 %v910_v14, %v725_v63  ;;  %v749_v30 = vadd.f32 %v910_v14, %v726_v24  ;;  %v750_v45 = vadd.f32 %v910_v14, %v727_v49  ;;  %v751_v46 = vadd.f32 %v910_v14, %v728_v50 }
 0x1be   :  { %v752_v48 = vadd.f32 %v910_v14, %v729_v5  ;;  %v753_v31 = vadd.f32 %v910_v14, %v730_v6  ;;  %v754_v33 = vadd.f32 %v910_v14, %v731_v36  ;;  %v755_v60 = vadd.f32 %v910_v14, %v732_v37 }
 0x1bf   :  { %v756_v39 = vadd.f32 %v910_v14, %v733_v15  ;;  %v757_v16 = vadd.f32 %v910_v14, %v734_v55  ;;  %v758_v3 = vadd.f32 %v910_v14, %v735_v26  ;;  %v759_v7 = vadd.f32 %v910_v14, %v736_v29 }
 0x1c0   :  { %vm761_vm2 = vcmp.ge.f32.partialorder %v745_v25, 0.0  ;;  %vm762_vm3 = vcmp.ge.f32.partialorder %v746_v38, 0.0  ;;  %vm763_vm4 = vcmp.ge.f32.partialorder %v747_v40, 0.0  ;;  %vm764_vm5 = vcmp.ge.f32.partialorder %v748_v41, 0.0 }
 0x1c1   :  { %vm765_vm6 = vcmp.ge.f32.partialorder %v749_v30, 0.0  ;;  %vm767_vm8 = vcmp.ge.f32.partialorder %v751_v46, 0.0  ;;  %vm768_vm9 = vcmp.ge.f32.partialorder %v752_v48, 0.0  ;;  %vm769_vm10 = vcmp.ge.f32.partialorder %v753_v31, 0.0 }
 0x1c2   :  { %vm770_vm11 = vcmp.ge.f32.partialorder %v754_v33, 0.0  ;;  %vm771_vm12 = vcmp.ge.f32.partialorder %v755_v60, 0.0  ;;  %vm772_vm14 = vcmp.ge.f32.partialorder %v756_v39, 0.0  ;;  %vm773_vm15 = vcmp.ge.f32.partialorder %v757_v16, 0.0 }
 0x1c3   :  { %vm774_vm0 = vcmp.ge.f32.partialorder %v758_v3, 0.0  ;;  %vm775_vm1 = vcmp.ge.f32.partialorder %v759_v7, 0.0  ;;  %v776_v17 = vmul.f32 0.2, %v744_v19  ;;  %v777_v18 = vmul.f32 0.2, %v745_v25 }
 0x1c4   :  { %v778_v8 = vmul.f32 0.2, %v746_v38  ;;  %v779_v20 = vmul.f32 0.2, %v747_v40  ;;  %v780_v9 = vmul.f32 0.2, %v748_v41 }
 0x1c5   :  { %v781_v10 = vmul.f32 0.2, %v749_v30  ;;  %v782_v59 = vmul.f32 0.2, %v750_v45  ;;  %v783_v27 = vmul.f32 0.2, %v751_v46  ;;  %v793_v51 = vsel %vm761_vm2, %v745_v25, %v777_v18 }
 0x1c6   :  { %v784_v28 = vmul.f32 0.2, %v752_v48  ;;  %vm1441_vm7 = vcmp.ge.f32.partialorder %v744_v19, 0.0  ;;  %v785_v21 = vmul.f32 0.2, %v753_v31  ;;  %v794_v42 = vsel %vm762_vm3, %v746_v38, %v778_v8 }
 0x1c7   :  { %v792_v47 = vsel %vm1441_vm7, %v744_v19, %v776_v17  ;;  %v786_v11 = vmul.f32 0.2, %v754_v33  ;;  %v787_v22 = vmul.f32 0.2, %v755_v60  ;;  %v788_v4 = vmul.f32 0.2, %v756_v39 }
 0x1c8   :  { %v789_v12 = vmul.f32 0.2, %v757_v16  ;;  %v790_v53 = vmul.f32 0.2, %v758_v3  ;;  %v791_v52 = vmul.f32 0.2, %v759_v7  ;;  %v795_v23 = vsel %vm763_vm4, %v747_v40, %v779_v20 }
 0x1c9   :  { %v796_v54 = vsel %vm764_vm5, %v748_v41, %v780_v9  ;;  %v797_v56 = vsel %vm765_vm6, %v749_v30, %v781_v10  ;;  %vm1442_vm13 = vcmp.ge.f32.partialorder %v750_v45, 0.0  ;;  %v799_v32 = vsel %vm767_vm8, %v751_v46, %v783_v27 }
 0x1ca   :  { %v798_v13 = vsel %vm1442_vm13, %v750_v45, %v782_v59  ;;  %v800_v61 = vsel %vm768_vm9, %v752_v48, %v784_v28  ;;  %v801_v58 = vsel %vm769_vm10, %v753_v31, %v785_v21  ;;  %v802_v62 = vsel %vm770_vm11, %v754_v33, %v786_v11 }
 0x1cb   :  { %v803_v63 = vsel %vm771_vm12, %v755_v60, %v787_v22  ;;  %v804_v24 = vsel %vm772_vm14, %v756_v39, %v788_v4  ;;  %v805_v0 = vsel %vm773_vm15, %v757_v16, %v789_v12  ;;  %v806_v14 = vsel %vm774_vm0, %v758_v3, %v790_v53 }
 0x1cc   :  { %v807_v57 = vsel %vm775_vm1, %v759_v7, %v791_v52  ;;  %v927_v1 = vpack.c.bf16 %v792_v47, %v792_v47  ;;  %v928_v49 = vpack.c.bf16 %v793_v51, %v793_v51  ;;  %v929_v50 = vpack.c.bf16 %v794_v42, %v794_v42 }
 0x1cd   :  { %v930_v43 = vpack.c.bf16 %v795_v23, %v795_v23  ;;  %v931_v44 = vpack.c.bf16 %v796_v54, %v796_v54  ;;  %v932_v2 = vpack.c.bf16 %v797_v56, %v797_v56  ;;  %v933_v5 = vpack.c.bf16 %v798_v13, %v798_v13 }
 0x1ce   :  { %v934_v6 = vpack.c.bf16 %v799_v32, %v799_v32  ;;  %v935_v34 = vpack.c.bf16 %v800_v61, %v800_v61  ;;  %v936_v35 = vpack.c.bf16 %v801_v58, %v801_v58  ;;  %vm1443_vm2 = vcmask 125952  }
 0x1cf   :  { %873 = vst.msk [vmem:[%s1440_s4] sm:$0xf] %vm1443_vm2, %v927_v1  ;;  %vm1444_vm3 = vmmov %vm1443_vm2  ;;  %v937_v36 = vpack.c.bf16 %v802_v62, %v802_v62  ;;  %v938_v37 = vpack.c.bf16 %v803_v63, %v803_v63  ;;  %v939_v15 = vpack.c.bf16 %v804_v24, %v804_v24  ;;  %v940_v55 = vpack.c.bf16 %v805_v0, %v805_v0 }
 0x1d0   :  { %874 = vst.msk [vmem:[%s1440_s4 + $0x4] sm:$0xf] %vm1444_vm3, %v928_v49  ;;  %vm1445_vm1 = vmmov %vm1443_vm2  ;;  %v941_v19 = vpack.c.bf16 %v806_v14, %v806_v14  ;;  %v942_v25 = vpack.c.bf16 %v807_v57, %v807_v57 }
 0x1d1   :  { %875 = vst.msk [vmem:[%s1440_s4 + $0x8] sm:$0xf] %vm1445_vm1, %v929_v50  ;;  %vm1446_vm4 = vmmov %vm1445_vm1 }
 0x1d2   :  { %876 = vst.msk [vmem:[%s1440_s4 + $0xc] sm:$0xf] %vm1446_vm4, %v930_v43  ;;  %vm1447_vm5 = vmmov %vm1445_vm1 }
 0x1d3   :  { %877 = vst.msk [vmem:[%s1440_s4 + $0x10] sm:$0xf] %vm1447_vm5, %v931_v44  ;;  %vm1448_vm6 = vmmov %vm1445_vm1 }
 0x1d4   :  { %878 = vst.msk [vmem:[%s1440_s4 + $0x14] sm:$0xf] %vm1448_vm6, %v932_v2  ;;  %vm1449_vm7 = vmmov %vm1445_vm1 }
 0x1d5   :  { %879 = vst.msk [vmem:[%s1440_s4 + $0x18] sm:$0xf] %vm1449_vm7, %v933_v5  ;;  %vm1450_vm8 = vmmov %vm1445_vm1 }
 0x1d6   :  { %880 = vst.msk [vmem:[%s1440_s4 + $0x1c] sm:$0xf] %vm1450_vm8, %v934_v6  ;;  %vm1451_vm9 = vmmov %vm1445_vm1 }
 0x1d7   :  { %881 = vst.msk [vmem:[%s1440_s4 + $0x20] sm:$0xf] %vm1451_vm9, %v935_v34  ;;  %vm1452_vm10 = vmmov %vm1445_vm1 }
 0x1d8   :  { %882 = vst.msk [vmem:[%s1440_s4 + $0x24] sm:$0xf] %vm1452_vm10, %v936_v35  ;;  %vm1453_vm11 = vmmov %vm1445_vm1 }
 0x1d9   :  { %883 = vst.msk [vmem:[%s1440_s4 + $0x28] sm:$0xf] %vm1453_vm11, %v937_v36  ;;  %vm1454_vm12 = vmmov %vm1445_vm1 }
 0x1da   :  { %884 = vst.msk [vmem:[%s1440_s4 + $0x2c] sm:$0xf] %vm1454_vm12, %v938_v37  ;;  %vm1455_vm13 = vmmov %vm1445_vm1 }
 0x1db   :  { %885 = vst.msk [vmem:[%s1440_s4 + $0x30] sm:$0xf] %vm1455_vm13, %v939_v15  ;;  %vm1456_vm14 = vmmov %vm1445_vm1 }
 0x1dc   :  { %886 = vst.msk [vmem:[%s1440_s4 + $0x34] sm:$0xf] %vm1456_vm14, %v940_v55  ;;  %vm1457_vm15 = vmmov %vm1445_vm1 }
 0x1dd   :  { %887 = vst.msk [vmem:[%s1440_s4 + $0x38] sm:$0xf] %vm1457_vm15, %v941_v19  ;;  %vm1458_vm0 = vmmov %vm1445_vm1 }
 0x1de   :  { %888 = vst.msk [vmem:[%s1440_s4 + $0x3c] sm:$0xf] %vm1458_vm0, %v942_v25 }

// kernel: tconv_generator_forward.4
= control target key start
LH: loop header
LB: loop body
LE: loop exit
PB: predicated region body
PF: predicated region fallthrough
CT: control target
= control target key end

     0   :  { %s1354_s15 = smov 0   ;;  %s1741_s0 = inlined_call_operand.vmem [shape: bf16[2,6,6,16], index: 0, kind: input, shape index: {}]   ;;  %s1742_s1 = inlined_call_operand.vmem [shape: bf16[4,64,8], index: 1, kind: input, shape index: {}]   ;;  %s1743_s2 = inlined_call_operand.vmem [shape: f32[1,8], index: 2, kind: input, shape index: {}]   ;;  %s1744_s3 = inlined_call_operand.vmem [shape: f32[1,8], index: 3, kind: input, shape index: {}]   ;;  %s1745_s4 = inlined_call_operand.vmem [shape: bf16[2,4,2,4,16], index: 4, kind: output, shape index: {}]  }
   0x1 LB: > { %s1146_s16 = sadd.s32 4294967295, %s1320_s15   ;;  %p1150_p0 = scmp.ge.s32.totalorder %s1320_s15, 1  ;;  %s1320_s15 = sphi %s1354_s15, %s14_s15  }
   0x2   : > { %p162_p1 = scmp.lt.s32.totalorder %s1320_s15, 3 }
   0x4   : > { %p163_p2 = pnand %p1150_p0, %p162_p1 }
   0x5   : > { %p188_p3 = scmp.lt.s32.totalorder (!%p163_p2), %s1146_s16, 1  ;;  %s1324_s9 = smov (!%p163_p2), 32  }
   0x6   : > { %166 = sbr.rel (%p163_p2) target bundleno = 559 (0x22f), region = 36  ;;  %s1325_s10 = smov (!%p163_p2), 16  }
   0x7   : > { %s1326_s13 = smov (!%p163_p2), 48  }
   0xb   : > { %v214_v0 = vlaneseq  ;;  %v1322_v1 = vmov 1983009808   ;;  %s1755_s16 = smov (!%p188_p3, %s1146_s16), 1  ;;  %vm350_vm0 = vcmask 1040384   ;;  %vm351_vm1 = vcmask 1042434   ;;  %v1296_v5 = vld [vmem:[%s1742_s1 + $0x18] sm:$0xff]  }
   0xc   : > { %v212_v2 = vunpack.c.l.s4 %v1322_v1  ;;  %s1275_s19 = smul.u32 24, %s1755_s16  ;;  %vm353_vm2 = vcmask 1044484   ;;  %v1323_v6 = vmov 0.0   ;;  %vm1375_vm3 = vmor %vm350_vm0, %vm351_vm1  ;;  %vm355_vm4 = vcmask 1046534   ;;  %v1297_v9 = vld [vmem:[%s1742_s1 + $0x38] sm:$0xff]   ;;  %v1298_v24 = vld [vmem:[%s1742_s1 + $0x10] sm:$0xff]  }
   0xd   : > { %v1364_v3 = vshrl.u32 %v214_v0, 7  ;;  %1227 = vmatprep.subr.bf16.mxu0 %v1323_v6  ;;  %1239 = vmatprep.subr.bf16.mxu1 %v1323_v6  ;;  %vm259_vm5 = vsmask.f32 1280  ;;  %vm260_vm6 = vsmask.f32 3336  ;;  %vm1420_vm7 = vmor %vm1375_vm3, %vm353_vm2  ;;  %v1299_v29 = vld [vmem:[%s1742_s1 + $0x30] sm:$0xff]  }
   0xe   : > { %v213_v4 = vunpack.c.0.s8 %v212_v2  ;;  %1228 = vmatpush3.bf16.msra.mxu0 %v1296_v5  ;;  %s1385_s24 = scalar_lea.vmem %s1741_s0, %s1275_s19  ;;  %1240 = vmatpush3.bf16.msra.mxu1 %v1297_v9  ;;  %vm262_vm8 = vsmask.f32 5392  ;;  %vm1459_vm9 = vmor %vm1420_vm7, %vm355_vm4  ;;  %vm264_vm10 = vsmask.f32 7448  ;;  %v1300_v34 = vld [vmem:[%s1742_s1 + $0x8] sm:$0xff]   ;;  %v1302_v48 = vld [vmem:[%s1742_s1] sm:$0xff]  }
   0xf   : > { %1229 = vmatprep.subr.bf16.mxu0 %v1323_v6  ;;  %v1389_v10 = vld [vmem:[%s1385_s24 + $0x4] sm:$0x7]  ;;  %v1392_v11 = vld [vmem:[%s1385_s24 + $0x8] sm:$0x7]  ;;  %v1395_v12 = vld [vmem:[%s1385_s24 + $0xc] sm:$0x7]  ;;  %1241 = vmatprep.subr.bf16.mxu1 %v1323_v6 }
  0x10   : > { %v1373_v7 = vsub.s32 %v213_v4, %v1364_v3  ;;  %v1398_v13 = vld [vmem:[%s1385_s24 + $0x10] sm:$0x7]  ;;  %v417_v16 = vcombine.low %v1389_v10, %v1392_v11  ;;  %v1411_v17 = vld [vmem:[%s1385_s24] sm:$0x7]  ;;  %v1301_v39 = vld [vmem:[%s1742_s1 + $0x28] sm:$0xff]   ;;  %vm1327_vm14 = vmmov 0  }
  0x11   : > { %v418_v21 = vcombine.low %v1395_v12, %v1398_v13  ;;  %v381_v23 = vcombine.low %v1411_v17, %v1389_v10  ;;  %vm261_vm11 = vmor %vm259_vm5, %vm260_vm6  ;;  %1235 = vmatprep.mubr.msk.bf16.mxu0 %vm1327_vm14, %v1323_v6  ;;  %1247 = vmatprep.mubr.msk.bf16.mxu1 %vm1327_vm14, %v1323_v6  ;;  %vm459_vm15 = vcmask 261120   ;;  %vm455_vm0 = vcmask 130048   ;;  %s1206_s11 = sshll.u32 %s1755_s16, 4 }
  0x12   : > { %v1402_v14 = vrot.slane %v1392_v11, %v1373_v7  ;;  %v1406_v15 = vrot.slane %v1395_v12, %v1373_v7  ;;  %v1415_v18 = vrot.slane %v1389_v10, %v1373_v7  ;;  %v1427_v20 = vrot.slane %v1398_v13, %v1373_v7  ;;  %1230 = vmatpush3.bf16.msra.mxu0 %v1298_v24  ;;  %vm263_vm12 = vmor %vm261_vm11, %vm262_vm8  ;;  %s197_s14 = scalar_lea.vmem %s1745_s4, %s1206_s11 }
  0x13   : > { %v217_v22 = vrot.slane %v1411_v17, %v1373_v7  ;;  %v425_v25 = vrot.slane %v417_v16, %v1373_v7  ;;  %v432_v31 = vrot.slane %v418_v21, %v1373_v7  ;;  %1231 = vmatprep.subr.bf16.mxu0 %v1323_v6  ;;  %1242 = vmatpush3.bf16.msra.mxu1 %v1299_v29  ;;  %vm1530_vm13 = vmor %vm263_vm12, %vm264_vm10  ;;  %vm462_vm1 = vcmask 392192  }
  0x14   : > { %v1441_v26 = vcombine.high %v1415_v18, %v1415_v18  ;;  %v1445_v27 = vcombine.high %v1402_v14, %v1402_v14  ;;  %v1449_v28 = vcombine.high %v1406_v15, %v1406_v15  ;;  %v323_v30 = vshrl.u32 %v1427_v20, 16  ;;  %1243 = vmatprep.subr.bf16.mxu1 %v1323_v6 }
  0x15   : > { %v218_v32 = vcombine.high %v217_v22, %v217_v22  ;;  %v1468_v35 = vcombine.high %v1427_v20, %v1427_v20  ;;  %v1154_v36 = vrot.slane %v217_v22, 9  ;;  %v1155_v37 = vrot.slane %v1415_v18, 9 }
  0x16   : > { %v363_v38 = vrot.slane %v1441_v26, 7  ;;  %v1476_v40 = vcombine.low %v425_v25, %v432_v31  ;;  %v1156_v42 = vrot.slane %v1402_v14, 9  ;;  %v367_v43 = vrot.slane %v1445_v27, 7  ;;  %1232 = vmatpush3.bf16.msra.mxu0 %v1300_v34 }
  0x17   : > { %v359_v41 = vrot.slane %v218_v32, 7  ;;  %v1157_v45 = vrot.slane %v1406_v15, 9  ;;  %v371_v46 = vrot.slane %v1449_v28, 7  ;;  %v1158_v47 = vrot.slane %v1427_v20, 9  ;;  %1233 = vmatprep.subr.bf16.mxu0 %v1323_v6  ;;  %1244 = vmatpush3.bf16.msra.mxu1 %v1301_v39 }
  0x18   : > { %v1483_v44 = vsel %vm1459_vm9, %v1155_v37, %v363_v38  ;;  %434 = vrot.lane.b32.xlu0 %v1476_v40, %s1324_s9  ;;  %v1497_v50 = vsel %vm1459_vm9, %v1156_v42, %v367_v43  ;;  %v375_v51 = vrot.slane %v1468_v35, 7  ;;  %v267_v52 = vshrl.u32 %v217_v22, 16  ;;  %1245 = vmatprep.subr.bf16.mxu1 %v1323_v6 }
  0x19   : > { %v360_v49 = vsel %vm1459_vm9, %v1154_v36, %v359_v41  ;;  %v326_v53 = vshll.u32 %v1427_v20, 16  ;;  %v1503_v54 = vsel %vm1459_vm9, %v1157_v45, %v371_v46  ;;  %v270_v56 = vshll.u32 %v217_v22, 16 }
  0x1a   : > { %v541_v55 = vcombine.low %v360_v49, %v1483_v44  ;;  %v542_v57 = vcombine.low %v1497_v50, %v1503_v54  ;;  %v269_v58 = vrot.slane %v267_v52, 6  ;;  %v276_v59 = vshll.u32 %v218_v32, 16  ;;  %1234 = vmatpush3.bf16.msra.mxu0 %v1302_v48  ;;  %v1536_v32 = vld [vmem:[%s1385_s24 + $0x14] sm:$0x7] }
  0x1b   : > { %v1514_v60 = vsel %vm1459_vm9, %v1158_v47, %v375_v51  ;;  %v272_v62 = vrot.slane %v270_v56, 7  ;;  %v281_v63 = vshrl.u32 %v1415_v18, 16  ;;  %v284_v2 = vshll.u32 %v1415_v18, 16  ;;  %1251 = vmatprep.subr.bf16.mxu0 %v1323_v6 }
  0x1c   : > { %v549_v61 = vrot.slane %v541_v55, %v1373_v7  ;;  %v1519_v0 = vrot.slane %v542_v57, %v1373_v7  ;;  %v278_v1 = vrot.slane %v276_v59, 7  ;;  %v290_v4 = vshll.u32 %v1441_v26, 16 }
  0x1d   : > { %v273_v5 = vor.u32 %v272_v62, %v269_v58  ;;  %v283_v8 = vrot.slane %v281_v63, 6  ;;  %v295_v9 = vshrl.u32 %v1402_v14, 16  ;;  %v298_v16 = vshll.u32 %v1402_v14, 16 }
  0x1e   : > { %v557_v19 = vcombine.low %v549_v61, %v1519_v0  ;;  %v286_v21 = vrot.slane %v284_v2, 7  ;;  %v292_v22 = vrot.slane %v290_v4, 7  ;;  %v304_v24 = vshll.u32 %v1445_v27, 16 }
  0x1f   : > { %v274_v25 = vrot.slane %v273_v5, 2  ;;  %v297_v26 = vrot.slane %v295_v9, 6  ;;  %v300_v29 = vrot.slane %v298_v16, 7  ;;  %v309_v31 = vshrl.u32 %v1406_v15, 16 }
  0x20   : > { %558 = vrot.lane.b32.xlu1 %v557_v19, %s1325_s10  ;;  %v287_v14 = vor.u32 %v286_v21, %v283_v8  ;;  %v306_v34 = vrot.slane %v304_v24, 7  ;;  %v312_v36 = vshll.u32 %v1406_v15, 16  ;;  %v318_v27 = vshll.u32 %v1449_v28, 16  ;;  %v1303_v15 = vld [vmem:[%s1742_s1 + $0x20] sm:$0xff]  }
  0x21   : > { %v562_v37 = vcombine.low %v1483_v44, %v1497_v50  ;;  %v301_v38 = vor.u32 %v300_v29, %v297_v26  ;;  %v311_v39 = vrot.slane %v309_v31, 6  ;;  %v325_v41 = vrot.slane %v323_v30, 6  ;;  %1246 = vmatpush3.bf16.msra.mxu1 %v1303_v15  ;;  %v1304_v15 = vld [vmem:[%s1742_s1 + $0x58] sm:$0xff]  }
  0x22   : > { %v279_v42 = vsel %vm1530_vm13, %v274_v25, %v278_v1  ;;  %v288_v43 = vrot.slane %v287_v14, 2  ;;  %v314_v45 = vrot.slane %v312_v36, 7  ;;  %v328_v46 = vrot.slane %v326_v53, 7  ;;  %1263 = vmatprep.subr.bf16.mxu1 %v1323_v6 }
  0x23   : > { %v563_v28 = vcombine.low %v1503_v54, %v1514_v60  ;;  %v302_v47 = vrot.slane %v301_v38, 2  ;;  %v320_v44 = vrot.slane %v318_v27, 7  ;;  %v332_v48 = vshll.u32 %v1468_v35, 16 }
  0x24   : > { %v293_v20 = vsel %vm1530_vm13, %v288_v43, %v292_v22  ;;  %v315_v30 = vor.u32 %v314_v45, %v311_v39  ;;  %v329_v49 = vor.u32 %v328_v46, %v325_v41  ;;  %v257_v50 = vrot.slane %v1536_v32, %v1373_v7 }
  0x25   : > { %v307_v51 = vsel %vm1530_vm13, %v302_v47, %v306_v34  ;;  %v334_v52 = vrot.slane %v332_v48, 7  ;;  %v398_v53 = vcombine.low %v279_v42, %v293_v20  ;;  %v382_v35 = vcombine.low %v1392_v11, %v1395_v12 }
  0x26   : > { %v316_v54 = vrot.slane %v315_v30, 2  ;;  %v330_v55 = vrot.slane %v329_v49, 2  ;;  %v436_v56 = vcombine.low %v293_v20, %v307_v51  ;;  %v258_v57 = vcombine.high %v257_v50, %v257_v50  ;;  %v1305_v20 = vld [vmem:[%s1742_s1 + $0x78] sm:$0xff]   ;;  %v1306_v49 = vld [vmem:[%s1742_s1 + $0x50] sm:$0xff]  }
  0x27   : > { %v337_v58 = vshrl.u32 %v257_v50, 16  ;;  %v570_v62 = vrot.slane %v562_v37, %v1373_v7  ;;  %v577_v63 = vrot.slane %v563_v28, %v1373_v7  ;;  %v406_v2 = vrot.slane %v398_v53, %v1373_v7  ;;  %v1307_v53 = vld [vmem:[%s1742_s1 + $0x70] sm:$0xff]  }
  0x28   : > { %v321_v59 = vsel %vm1530_vm13, %v316_v54, %v320_v44  ;;  %v335_v61 = vsel %vm1530_vm13, %v330_v55, %v334_v52  ;;  %v444_v5 = vrot.slane %v436_v56, %v1373_v7  ;;  %v666_v11 = vcombine.low %v1398_v13, %v1536_v32  ;;  %v1308_v54 = vld [vmem:[%s1742_s1 + $0x48] sm:$0xff]  }
  0x29   : > { %v399_v1 = vcombine.low %v307_v51, %v321_v59  ;;  %v437_v4 = vcombine.low %v321_v59, %v335_v61  ;;  %v339_v12 = vrot.slane %v337_v58, 6  ;;  %v340_v8 = vshll.u32 %v257_v50, 16  ;;  %v1309_v56 = vld [vmem:[%s1742_s1 + $0x68] sm:$0xff]   ;;  %v1310_v58 = vld [vmem:[%s1742_s1 + $0x40] sm:$0xff]  }
  0x2a   : > { %v346_v9 = vshll.u32 %v258_v57, 16  ;;  %v396_v21 = vrot.slane %v382_v35, %v1373_v7  ;;  %v389_v22 = vrot.slane %v381_v23, %v1373_v7  ;;  %v1159_v25 = vrot.slane %v257_v50, 9 }
  0x2b   : > { %v413_v16 = vrot.slane %v399_v1, %v1373_v7  ;;  %v451_v19 = vrot.slane %v437_v4, %v1373_v7  ;;  %v342_v24 = vrot.slane %v340_v8, 7  ;;  %v379_v26 = vrot.slane %v258_v57, 7 }
  0x2c   : > { %v397_v13 = vcombine.low %v389_v22, %v396_v21  ;;  %v348_v14 = vrot.slane %v346_v9, 7  ;;  %v578_v34 = vcombine.low %v570_v62, %v577_v63  ;;  %v673_v36 = vrot.slane %v666_v11, %v1373_v7 }
  0x2d   : > { %v414_v29 = vcombine.low %v406_v2, %v413_v16  ;;  %v1579_v31 = vcombine.low %v444_v5, %v451_v19  ;;  %v343_v32 = vor.u32 %v342_v24, %v339_v12  ;;  %v380_v10 = vsel %vm1459_vm9, %v1159_v25, %v379_v26 }
  0x2e   : > { %v674_v23 = vcombine.low %v396_v21, %v673_v36  ;;  %v775_v38 = vcombine.low %v1514_v60, %v380_v10  ;;  %vm497_vm2 = vcmask 523264   ;;  %vm869_vm3 = vcmask 64512  }
  0x2f   : > { %415 = vrot.lane.b32.xlu0 %v414_v29, %s1325_s10  ;;  %453 = vrot.lane.b32.xlu1 %v1579_v31, %s1326_s13  ;;  %v344_v27 = vrot.slane %v343_v32, 2  ;;  %vm1082_vm12 = vcmask 123904  }
  0x30   : > { %v782_v41 = vrot.slane %v775_v38, %v1373_v7 }
  0x31   : > { %v349_v17 = vsel %vm1530_vm13, %v344_v27, %v348_v14 }
  0x32   : > { %v677_v37 = vcombine.low %v335_v61, %v349_v17  ;;  %v783_v18 = vcombine.low %v1519_v0, %v782_v41 }
  0x33   : > { %560 = vrot.lane.b32.xlu0 %v1579_v31, %s1324_s9  ;;  %579 = vrot.lane.b32.xlu1 %v578_v34, %s1326_s13 }
  0x34   : > { %v684_v33 = vrot.slane %v677_v37, %v1373_v7 }
  0x36   : > { %v685_v39 = vcombine.low %v413_v16, %v684_v33 }
  0x37   : > { %664 = vrot.lane.b32.xlu0 %v1579_v31, %s1325_s10  ;;  %675 = vrot.lane.b32.xlu1 %v674_v23, %s1324_s9 }
  0x3b   : > { %686 = vrot.lane.b32.xlu0 %v685_v39, %s1326_s13  ;;  %771 = vrot.lane.b32.xlu1 %v578_v34, %s1325_s10  ;;  %s1328_s10 = smov 8  }
  0x3f   : > { %773 = vrot.lane.b32.xlu0 %v685_v39, %s1324_s9  ;;  %784 = vrot.lane.b32.xlu1 %v783_v18, %s1326_s13 }
  0x8a   : > { %v435_v42 = vpop.permute.xlu0 %434 }
  0x92   : > { %v559_v60 = vpop.permute.xlu1 %558 }
  0x93   : > { %v583_v47 = vsel %vm455_vm0, %v414_v29, %v559_v60 }
  0xa1   : > { %v416_v43 = vpop.permute.xlu0 %415  ;;  %v454_v45 = vpop.permute.xlu1 %453 }
  0xa2   : > { %v458_v46 = vsel %vm455_vm0, %v397_v13, %v416_v43 }
  0xa3   : > { %v461_v28 = vsel %vm459_vm15, %v458_v46, %v435_v42 }
  0xa4   : > { %v464_v0 = vsel %vm462_vm1, %v461_v28, %v454_v45 }
  0xa5   : > { %1236 = vmatmul.mubr.msk.bf16.vlgmr.msra.gmra.mxu0 %vm497_vm2, %v464_v0  ;;  %v561_v44 = vpop.permute.xlu0 %560  ;;  %v580_v48 = vpop.permute.xlu1 %579 }
  0xa6   : > { %1252 = vmatpush3.bf16.msra.mxu0 %v1304_v15  ;;  %v585_v30 = vsel %vm459_vm15, %v583_v47, %v561_v44  ;;  %1259 = vmatprep.mubr.msk.bf16.mxu0 %vm1327_vm14, %v1323_v6 }
  0xa7   : > { %v587_v50 = vsel %vm462_vm1, %v585_v30, %v580_v48  ;;  %1253 = vmatprep.subr.bf16.mxu0 %v1323_v6 }
  0xa8   : > { %1248 = vmatmul.mubr.msk.bf16.vlgmr.msra.gmra.mxu1 %vm497_vm2, %v587_v50 }
  0xa9   : > { %1264 = vmatpush3.bf16.msra.mxu1 %v1305_v20  ;;  %v665_v51 = vpop.permute.xlu0 %664  ;;  %v676_v52 = vpop.permute.xlu1 %675  ;;  %1271 = vmatprep.mubr.msk.bf16.mxu1 %vm1327_vm14, %v1323_v6 }
  0xaa   : > { %1254 = vmatpush3.bf16.msra.mxu0 %v1306_v49  ;;  %1265 = vmatprep.subr.bf16.mxu1 %v1323_v6  ;;  %v690_v35 = vsel %vm455_vm0, %v1476_v40, %v665_v51  ;;  %v1311_v40 = vld [vmem:[%s1742_s1 + $0x60] sm:$0xff]  }
  0xab   : > { %1255 = vmatprep.subr.bf16.mxu0 %v1323_v6  ;;  %v692_v59 = vsel %vm459_vm15, %v690_v35, %v676_v52 }
  0xad   : > { %1266 = vmatpush3.bf16.msra.mxu1 %v1307_v53  ;;  %v687_v55 = vpop.permute.xlu0 %686  ;;  %v772_v57 = vpop.permute.xlu1 %771 }
  0xae   : > { %1256 = vmatpush3.bf16.msra.mxu0 %v1308_v54  ;;  %1267 = vmatprep.subr.bf16.mxu1 %v1323_v6  ;;  %v788_v61 = vsel %vm455_vm0, %v1579_v31, %v772_v57  ;;  %v694_v63 = vsel %vm462_vm1, %v692_v59, %v687_v55 }
  0xaf   : > { %1257 = vmatprep.subr.bf16.mxu0 %v1323_v6 }
  0xb1   : > { %1268 = vmatpush3.bf16.msra.mxu1 %v1309_v56  ;;  %v774_v62 = vpop.permute.xlu0 %773  ;;  %v785_v2 = vpop.permute.xlu1 %784 }
  0xb2   : > { %1258 = vmatpush3.bf16.msra.mxu0 %v1310_v58  ;;  %1269 = vmatprep.subr.bf16.mxu1 %v1323_v6  ;;  %v790_v1 = vsel %vm459_vm15, %v788_v61, %v774_v62 }
  0xb3   : > { %v792_v4 = vsel %vm462_vm1, %v790_v1, %v785_v2 }
  0xb5   : > { %1260 = vmatmul.mubr.msk.bf16.vlgmr.msra.gmra.mxu0 %vm497_vm2, %v694_v63  ;;  %1270 = vmatpush3.bf16.msra.mxu1 %v1311_v40 }
  0xb8   : > { %1272 = vmatmul.mubr.msk.bf16.vlgmr.msra.gmra.mxu1 %vm497_vm2, %v792_v4 }
 0x165   : > { %v1655_v5 = vpop.f32.mrf.mxu0 }
 0x166   : > { %v880_v12 = vmul.f32 %v1655_v5, %v1655_v5  ;;  %v870_v9 = vsel %vm869_vm3, %v1655_v5, 0.0 }
 0x167   : > { %v1237_v11 = vpop.f32.mrf.mxu0 }
 0x168   : > { %v1659_v6 = vpop.f32.mrf.mxu1  ;;  %v882_v26 = vsel %vm869_vm3, %v880_v12, 0.0 }
 0x169   : > { %v1661_v8 = vpop.f32.mrf.mxu0  ;;  %v902_v22 = vmul.f32 %v1659_v6, %v1659_v6  ;;  %v892_v13 = vsel %vm869_vm3, %v1659_v6, 0.0 }
 0x16a   : > { %v871_v16 = vsel %vm869_vm3, %v1661_v8, 0.0  ;;  %v881_v19 = vmul.f32 %v1661_v8, %v1661_v8  ;;  %v1249_v21 = vpop.f32.mrf.mxu1 }
 0x16b   : > { %v872_v24 = vadd.f32 %v871_v16, %v870_v9  ;;  %v1238_v25 = vpop.f32.mrf.mxu0  ;;  %v904_v10 = vsel %vm869_vm3, %v902_v22, 0.0 }
 0x16c   : > { %v883_v29 = vsel %vm869_vm3, %v881_v19, 0.0  ;;  %v1673_v31 = vpop.f32.mrf.mxu1 }
 0x16d   : > { %v884_v32 = vadd.f32 %v883_v29, %v882_v26  ;;  %v893_v14 = vsel %vm869_vm3, %v1673_v31, 0.0  ;;  %v903_v34 = vmul.f32 %v1673_v31, %v1673_v31  ;;  %v873_v17 = vrot.slane %v872_v24, 4 }
 0x16e   : > { %v894_v36 = vadd.f32 %v893_v14, %v892_v13  ;;  %v1250_v27 = vpop.f32.mrf.mxu1 }
 0x16f   : > { %v905_v23 = vsel %vm869_vm3, %v903_v34, 0.0  ;;  %v885_v33 = vrot.slane %v884_v32, 4  ;;  %v874_v18 = vadd.f32 %v873_v17, %v872_v24 }
 0x170   : > { %v895_v37 = vrot.slane %v894_v36, 4  ;;  %v906_v38 = vadd.f32 %v905_v23, %v904_v10 }
 0x171   : > { %v886_v60 = vadd.f32 %v885_v33, %v884_v32  ;;  %v875_v46 = vrot.slane %v874_v18, 2 }
 0x172   : > { %v896_v39 = vadd.f32 %v895_v37, %v894_v36  ;;  %v907_v41 = vrot.slane %v906_v38, 4 }
 0x173   : > { %v887_v44 = vrot.slane %v886_v60, 2  ;;  %v876_v52 = vadd.f32 %v875_v46, %v874_v18 }
 0x174   : > { %v908_v42 = vadd.f32 %v907_v41, %v906_v38  ;;  %v897_v45 = vrot.slane %v896_v39, 2 }
 0x175   : > { %v1683_v43 = vpop.f32.mrf.mxu0  ;;  %v888_v1 = vadd.f32 %v887_v44, %v886_v60  ;;  %v877_v24 = vrot.slane %v876_v52, 1 }
 0x176   : > { %v909_v28 = vrot.slane %v908_v42, 2  ;;  %v924_v0 = vmul.f32 %v1683_v43, %v1683_v43  ;;  %v898_v20 = vadd.f32 %v897_v45, %v896_v39  ;;  %v914_v30 = vsel %vm869_vm3, %v1683_v43, 0.0 }
 0x177   : > { %v1261_v15 = vpop.f32.mrf.mxu0  ;;  %v889_v14 = vrot.slane %v888_v1, 1  ;;  %v878_v23 = vadd.f32 %v877_v24, %v876_v52 }
 0x178   : > { %v1687_v47 = vpop.f32.mrf.mxu1  ;;  %v910_v56 = vadd.f32 %v909_v28, %v908_v42  ;;  %v926_v35 = vsel %vm869_vm3, %v924_v0, 0.0  ;;  %v899_v2 = vrot.slane %v898_v20, 1 }
 0x179   : > { %v1689_v48 = vpop.f32.mrf.mxu0  ;;  %v946_v53 = vmul.f32 %v1687_v47, %v1687_v47  ;;  %v936_v57 = vsel %vm869_vm3, %v1687_v47, 0.0  ;;  %v890_v18 = vadd.f32 %v889_v14, %v888_v1 }
 0x17a   : > { %v915_v49 = vsel %vm869_vm3, %v1689_v48, 0.0  ;;  %v925_v50 = vmul.f32 %v1689_v48, %v1689_v48  ;;  %v1273_v51 = vpop.f32.mrf.mxu1  ;;  %v911_v25 = vrot.slane %v910_v56, 1  ;;  %v900_v34 = vadd.f32 %v899_v2, %v898_v20 }
 0x17b   : > { %v916_v54 = vadd.f32 %v915_v49, %v914_v30  ;;  %v1262_v55 = vpop.f32.mrf.mxu0  ;;  %v948_v12 = vsel %vm869_vm3, %v946_v53, 0.0 }
 0x17c   : > { %v927_v58 = vsel %vm869_vm3, %v925_v50, 0.0  ;;  %v865_v59 = vpop.f32.mrf.mxu1  ;;  %v912_v37 = vadd.f32 %v911_v25, %v910_v56  ;;  %v901_v42 = vadd.f32 %v900_v34, %v878_v23 }
 0x17d   : > { %v917_v61 = vrot.slane %v916_v54, 4  ;;  %v928_v62 = vadd.f32 %v927_v58, %v926_v35  ;;  %v937_v40 = vsel %vm869_vm3, %v865_v59, 0.0  ;;  %v947_v63 = vmul.f32 %v865_v59, %v865_v59 }
 0x17e   : > { %v938_v4 = vadd.f32 %v937_v40, %v936_v57  ;;  %v1274_v11 = vpop.f32.mrf.mxu1  ;;  %v913_v28 = vadd.f32 %v912_v37, %v890_v18  ;;  %v963_v57 = vld [vmem:[%s1743_s2] sm:$0x1]  ;;  %v973_v58 = vsub.s32 0, %v1364_v3 }
 0x17f   : > { %v918_v9 = vadd.f32 %v917_v61, %v916_v54  ;;  %v929_v16 = vrot.slane %v928_v62, 4  ;;  %v949_v19 = vsel %vm869_vm3, %v947_v63, 0.0  ;;  %v967_v40 = vld [vmem:[%s1744_s3] sm:$0x1] }
 0x180   : > { %v939_v21 = vrot.slane %v938_v4, 4  ;;  %v950_v22 = vadd.f32 %v949_v19, %v948_v12 }
 0x181   : > { %v919_v26 = vrot.slane %v918_v9, 2  ;;  %v930_v29 = vadd.f32 %v929_v16, %v928_v62 }
 0x182   : > { %v940_v13 = vadd.f32 %v939_v21, %v938_v4  ;;  %v951_v32 = vrot.slane %v950_v22, 4 }
 0x183   : > { %v920_v36 = vadd.f32 %v919_v26, %v918_v9  ;;  %v931_v27 = vrot.slane %v930_v29, 2 }
 0x184   : > { %v941_v10 = vrot.slane %v940_v13, 2  ;;  %v952_v17 = vadd.f32 %v951_v32, %v950_v22 }
 0x185   : > { %v921_v38 = vrot.slane %v920_v36, 1  ;;  %v932_v33 = vadd.f32 %v931_v27, %v930_v29 }
 0x186   : > { %v942_v39 = vadd.f32 %v941_v10, %v940_v13  ;;  %v953_v41 = vrot.slane %v952_v17, 2 }
 0x187   : > { %v922_v60 = vadd.f32 %v921_v38, %v920_v36  ;;  %v933_v45 = vrot.slane %v932_v33, 1 }
 0x188   : > { %v943_v46 = vrot.slane %v942_v39, 1  ;;  %v954_v15 = vadd.f32 %v953_v41, %v952_v17 }
 0x189   : > { %v923_v0 = vadd.f32 %v922_v60, %v901_v42  ;;  %v934_v44 = vadd.f32 %v933_v45, %v932_v33 }
 0x18a   : > { %v944_v20 = vadd.f32 %v943_v46, %v942_v39  ;;  %v955_v30 = vrot.slane %v954_v15, 1 }
 0x18b   : > { %v935_v49 = vadd.f32 %v934_v44, %v913_v28 }
 0x18c   : > { %v945_v50 = vadd.f32 %v944_v20, %v923_v0  ;;  %v956_v51 = vadd.f32 %v955_v30, %v954_v15 }
 0x18e   : > { %v957_v52 = vadd.f32 %v956_v51, %v935_v49  ;;  %v959_v53 = vmul.f32 0.015625, %v945_v50 }
 0x190   : > { %v960_v54 = vmul.f32 0.015625, %v957_v52  ;;  %v961_v55 = vmul.f32 %v959_v53, %v959_v53 }
 0x192   : > { %v962_v56 = vsub.f32 %v960_v54, %v961_v55 }
 0x194   : > { %v964_v35 = vadd.f32 1e-05, %v962_v56 }
 0x196   : > { %1312 = vrsqrt.f32 %v964_v35 }
 0x1a3   : > { %v1313_v61 = vpop.eup %1312 }
 0x1a4   : > { %v966_v62 = vmul.f32 %v1313_v61, %v963_v57 }
 0x1a6   : > { %v968_v63 = vmul.f32 %v966_v62, %v959_v53  ;;  %v974_v1 = vrot.slane %v966_v62, %v973_v58 }
 0x1a8   : > { %v969_v2 = vsub.f32 %v967_v40, %v968_v63  ;;  %v1016_v4 = vmul.f32 %v974_v1, %v865_v59  ;;  %v1015_v11 = vmul.f32 %v974_v1, %v1687_v47  ;;  %v1004_v12 = vmul.f32 %v974_v1, %v1683_v43 }
 0x1a9   : > { %v1005_v9 = vmul.f32 %v974_v1, %v1689_v48  ;;  %v993_v19 = vmul.f32 %v974_v1, %v1659_v6  ;;  %v994_v3 = vmul.f32 %v974_v1, %v1673_v31  ;;  %v977_v21 = vmul.f32 %v974_v1, %v1661_v8 }
 0x1aa   : > { %v982_v16 = vrot.slane %v969_v2, %v973_v58  ;;  %v976_v22 = vmul.f32 %v974_v1, %v1655_v5 }
 0x1ac   : > { %v1018_v24 = vadd.f32 %v1016_v4, %v982_v16  ;;  %v1017_v25 = vadd.f32 %v1015_v11, %v982_v16  ;;  %v995_v26 = vadd.f32 %v993_v19, %v982_v16  ;;  %v996_v29 = vadd.f32 %v994_v3, %v982_v16 }
 0x1ad   : > { %v1006_v59 = vadd.f32 %v1004_v12, %v982_v16  ;;  %v1007_v13 = vadd.f32 %v1005_v9, %v982_v16  ;;  %v984_v47 = vadd.f32 %v982_v16, %v976_v22  ;;  %v985_v32 = vadd.f32 %v982_v16, %v977_v21 }
 0x1ae   : > { %vm1019_vm4 = vcmp.ge.f32.partialorder %v1017_v25, 0.0  ;;  %vm1020_vm5 = vcmp.ge.f32.partialorder %v1018_v24, 0.0  ;;  %v1021_v43 = vmul.f32 0.2, %v1017_v25  ;;  %v1022_v48 = vmul.f32 0.2, %v1018_v24 }
 0x1af   : > { %vm997_vm6 = vcmp.ge.f32.partialorder %v995_v26, 0.0  ;;  %vm998_vm7 = vcmp.ge.f32.partialorder %v996_v29, 0.0  ;;  %v999_v6 = vmul.f32 0.2, %v995_v26  ;;  %v1000_v31 = vmul.f32 0.2, %v996_v29 }
 0x1b0   : > { %v1023_v14 = vsel %vm1019_vm4, %v1017_v25, %v1021_v43  ;;  %v1024_v8 = vsel %vm1020_vm5, %v1018_v24, %v1022_v48  ;;  %vm1008_vm8 = vcmp.ge.f32.partialorder %v1006_v59, 0.0  ;;  %vm1009_vm9 = vcmp.ge.f32.partialorder %v1007_v13, 0.0 }
 0x1b1   : > { %v1025_v5 = vpack.c.bf16 %v1024_v8, %v1023_v14  ;;  %v1001_v34 = vsel %vm997_vm6, %v995_v26, %v999_v6  ;;  %v1002_v36 = vsel %vm998_vm7, %v996_v29, %v1000_v31  ;;  %v1010_v27 = vmul.f32 0.2, %v1006_v59 }
 0x1b2   : > { %v1003_v10 = vpack.c.bf16 %v1002_v36, %v1001_v34  ;;  %v1011_v17 = vmul.f32 0.2, %v1007_v13  ;;  %vm986_vm10 = vcmp.ge.f32.partialorder %v984_v47, 0.0  ;;  %vm987_vm11 = vcmp.ge.f32.partialorder %v985_v32, 0.0 }
 0x1b3   : > { %1055 = vrot.lane.b32.xlu1 %v1025_v5, %s1328_s10  ;;  %v1012_v23 = vsel %vm1008_vm8, %v1006_v59, %v1010_v27  ;;  %v988_v37 = vmul.f32 0.2, %v984_v47  ;;  %v989_v38 = vmul.f32 0.2, %v985_v32 }
 0x1b4   : > { %1027 = vrot.lane.b32.xlu0 %v1003_v10, %s1328_s10  ;;  %v1013_v33 = vsel %vm1009_vm9, %v1007_v13, %v1011_v17 }
 0x1b5   : > { %v1014_v39 = vpack.c.bf16 %v1013_v33, %v1012_v23  ;;  %v990_v41 = vsel %vm986_vm10, %v984_v47, %v988_v37  ;;  %v991_v18 = vsel %vm987_vm11, %v985_v32, %v989_v38 }
 0x1b6   : > { %v992_v42 = vpack.c.bf16 %v991_v18, %v990_v41 }
 0x225   : > { %v1056_v60 = vpop.permute.xlu1 %1055 }
 0x226   : > { %v1059_v45 = vsel %vm869_vm3, %v1014_v39, %v1056_v60  ;;  %v1028_v46 = vpop.permute.xlu0 %1027 }
 0x227   : > { %v1061_v15 = vcombine.high %v1059_v45, %v1059_v45  ;;  %v1068_v28 = vrot.slane %v1059_v45, %v1373_v7  ;;  %v1031_v0 = vsel %vm869_vm3, %v992_v42, %v1028_v46 }
 0x228   : > { %v1033_v44 = vcombine.high %v1031_v0, %v1031_v0  ;;  %v1040_v20 = vrot.slane %v1031_v0, %v1373_v7 }
 0x229   : > { %v1075_v30 = vrot.slane %v1061_v15, %v1373_v7  ;;  %v1076_v49 = vcombine.high %v1068_v28, %v1068_v28  ;;  %1084 = vst.msk [vmem:[%s197_s14 + $0x2] sm:$0x3] %vm1082_vm12, %v1068_v28 }
 0x22a   : > { %v1047_v50 = vrot.slane %v1033_v44, %v1373_v7  ;;  %v1048_v51 = vcombine.high %v1040_v20, %v1040_v20  ;;  %1083 = vst.msk [vmem:[%s197_s14] sm:$0x3] %vm1082_vm12, %v1040_v20 }
 0x22b   : > { %v1077_v52 = vcombine.high %v1075_v30, %v1075_v30  ;;  %1086 = vst.msk [vmem:[%s197_s14 + $0x6] sm:$0x3] %vm1082_vm12, %v1076_v49  ;;  %1088 = vst.msk [vmem:[%s197_s14 + $0xa] sm:$0x3] %vm1082_vm12, %v1075_v30 }
 0x22c   : > { %v1049_v53 = vcombine.high %v1047_v50, %v1047_v50  ;;  %1085 = vst.msk [vmem:[%s197_s14 + $0x4] sm:$0x3] %vm1082_vm12, %v1048_v51  ;;  %1087 = vst.msk [vmem:[%s197_s14 + $0x8] sm:$0x3] %vm1082_vm12, %v1047_v50 }
 0x22d   : > { %1090 = vst.msk [vmem:[%s197_s14 + $0xe] sm:$0x3] %vm1082_vm12, %v1077_v52 }
 0x22e   : > { %1089 = vst.msk [vmem:[%s197_s14 + $0xc] sm:$0x3] %vm1082_vm12, %v1049_v53 }
 0x22f PF: > { %s14_s15 = sadd.s32 1, %s1320_s15  }
 0x230   : > { %p11_p4 = scmp.ge.s32.totalorder %s14_s15, 4  }
 0x232   :  { %13 = sbr.rel (!%p11_p4) target bundleno = 1 (0x1), region = 69 }

// kernel: tconv_generator_forward.5
= control target key start
LH: loop header
LB: loop body
LE: loop exit
PB: predicated region body
PF: predicated region fallthrough
CT: control target
= control target key end

     0   :  { %s1501_s12 = smov 0   ;;  %s2050_s0 = inlined_call_operand.vmem [shape: bf16[2,10,10,8], index: 0, kind: input, shape index: {}]   ;;  %s2051_s1 = inlined_call_operand.vmem [shape: bf16[4,32,3], index: 1, kind: input, shape index: {}]   ;;  %s2052_s2 = inlined_call_operand.vmem [shape: f32[1,3], index: 2, kind: input, shape index: {}]   ;;  %s2053_s3 = inlined_call_operand.vmem [shape: f32[2,8,2,8,6], index: 3, kind: output, shape index: {}]  }
   0x1 LB: > { %s1218_s13 = sadd.s32 4294967295, %s1475_s12   ;;  %p1222_p0 = scmp.ge.s32.totalorder %s1475_s12, 1  ;;  %s1475_s12 = sphi %s1501_s12, %s13_s12  }
   0x2   : > { %p137_p1 = scmp.lt.s32.totalorder %s1475_s12, 3 }
   0x4   : > { %p138_p2 = pnand %p1222_p0, %p137_p1 }
   0x5   : > { %p161_p3 = scmp.lt.s32.totalorder (!%p138_p2), %s1218_s13, 1  ;;  %s1477_s20 = smov (!%p138_p2), 24  }
   0x6   : > { %141 = sbr.rel (%p138_p2) target bundleno = 531 (0x213), region = 32  ;;  %s1478_s23 = smov (!%p138_p2), 8  }
   0x7   : > { %s1479_s24 = smov (!%p138_p2), 16  }
   0xb   : > { %s2059_s13 = smov (!%p161_p3, %s1218_s13), 1  ;;  %vm355_vm0 = vcmask 1042432   ;;  %vm356_vm1 = vcmask 1046532   ;;  %vm192_vm3 = vsmask.f32 3328  ;;  %v1390_v36 = vld [vmem:[%s2051_s1 + $0x18] sm:$0xff]  }
   0xc   : > { %s1375_s14 = smul.u32 80, %s2059_s13  ;;  %vm1531_vm2 = vmor %vm355_vm0, %vm356_vm1  ;;  %vm193_vm4 = vsmask.f32 7440  ;;  %1339 = vmatprep.subr.bf16.mxu1 %v1390_v36  ;;  %v1393_v59 = vld [vmem:[%s2051_s1 + $0x10] sm:$0xff]   ;;  %v1402_v8 = vld [vmem:[%s2051_s1] sm:$0xff]   ;;  %vm456_vm6 = vcmask 64512  }
   0xd   : > { %1340 = vmatpush3.bf16.msra.mxu1 %v1390_v36  ;;  %vm1643_vm5 = vmor %vm192_vm3, %vm193_vm4  ;;  %vm469_vm7 = vcmask 130048   ;;  %vm478_vm8 = vcmask 195584   ;;  %vm704_vm9 = vcmask 261120   ;;  %s1302_s15 = sshll.u32 %s2059_s13, 7  ;;  %vm1097_vm10 = vcmask 23552  }
   0xe   : > { %s1515_s17 = scalar_lea.vmem %s2050_s0, %s1375_s14  ;;  %1341 = vmatprep.subr.bf16.mxu1 %v1393_v59  ;;  %s1480_s14 = smov 3   ;;  %vm1146_vm11 = vcmask 48128  }
   0xf   : > { %v1518_v0 = vld [vmem:[%s1515_s17 + $0x18] sm:$0xf]  ;;  %v179_v1 = vld [vmem:[%s1515_s17 + $0x1c] sm:$0x1]  ;;  %v1522_v2 = vld [vmem:[%s1515_s17 + $0x20] sm:$0xf]  ;;  %s1988_s18 = scalar_lea.vmem %s2053_s3, %s1302_s15 }
  0x10   : > { %v181_v3 = vld [vmem:[%s1515_s17 + $0x24] sm:$0x1]  ;;  %v1526_v4 = vld [vmem:[%s1515_s17 + $0x2c] sm:$0x1]  ;;  %v1529_v5 = vld [vmem:[%s1515_s17 + $0x28] sm:$0xf] }
  0x11   : > { %v247_v6 = vshll.u32 %v179_v1, 16  ;;  %v261_v7 = vshll.u32 %v181_v3, 16  ;;  %v1229_v9 = vrot.slane %v1518_v0, 9  ;;  %v372_v10 = vrot.slane %v179_v1, 5  ;;  %v177_v14 = vld [vmem:[%s1515_s17 + $0x14] sm:$0x1]  ;;  %1342 = vmatpush3.bf16.msra.mxu1 %v1393_v59 }
  0x12   : > { %v1230_v11 = vrot.slane %v1522_v2, 9  ;;  %v376_v12 = vrot.slane %v181_v3, 5  ;;  %v1231_v13 = vrot.slane %v1529_v5, 9  ;;  %v275_v15 = vshll.u32 %v1526_v4, 16  ;;  %v1542_v17 = vld [vmem:[%s1515_s17 + $0x10] sm:$0xf] }
  0x13   : > { %v380_v16 = vrot.slane %v1526_v4, 5  ;;  %v1545_v18 = vld [vmem:[%s1515_s17] sm:$0xf]  ;;  %v373_v19 = vsel %vm1531_vm2, %v1229_v9, %v372_v10  ;;  %v233_v21 = vshll.u32 %v177_v14, 16  ;;  %v1228_v22 = vrot.slane %v1542_v17, 9 }
  0x14   : > { %v377_v20 = vsel %vm1531_vm2, %v1230_v11, %v376_v12  ;;  %v1553_v23 = vld [vmem:[%s1515_s17 + $0x4] sm:$0x1]  ;;  %v1556_v24 = vld [vmem:[%s1515_s17 + $0x8] sm:$0xf]  ;;  %v1558_v25 = vrot.slane %v247_v6, 5  ;;  %v368_v28 = vrot.slane %v177_v14, 5 }
  0x15   : > { %v1562_v26 = vsel %vm1531_vm2, %v1231_v13, %v380_v16  ;;  %v1564_v27 = vcombine.low %v373_v19, %v377_v20  ;;  %v175_v29 = vld [vmem:[%s1515_s17 + $0xc] sm:$0x1]  ;;  %v1568_v30 = vld [vmem:[%s1515_s17 + $0x30] sm:$0xf]  ;;  %v1570_v31 = vrot.slane %v261_v7, 5  ;;  %v1226_v34 = vrot.slane %v1545_v18, 9 }
  0x16   : > { %v1573_v32 = vcombine.low %v377_v20, %v1562_v26  ;;  %v219_v33 = vshll.u32 %v175_v29, 16  ;;  %v1577_v35 = vld [vmem:[%s1515_s17 + $0x34] sm:$0x1]  ;;  %v369_v37 = vsel %vm1531_vm2, %v1228_v22, %v368_v28  ;;  %v360_v38 = vrot.slane %v1553_v23, 5  ;;  %v1589_v41 = vld [vmem:[%s1515_s17 + $0x38] sm:$0xf] }
  0x17   : > { %526 = vrot.lane.b32.xlu1 %v1564_v27, %s1477_s20  ;;  %v1227_v39 = vrot.slane %v1556_v24, 9  ;;  %v364_v40 = vrot.slane %v175_v29, 5  ;;  %v1591_v42 = vrot.slane %v233_v21, 5  ;;  %v1593_v43 = vcombine.low %v369_v37, %v373_v19  ;;  %v187_v45 = vld [vmem:[%s1515_s17 + $0x3c] sm:$0x1] }
  0x18   : > { %v221_v44 = vrot.slane %v219_v33, 5  ;;  %v1232_v46 = vrot.slane %v1568_v30, 9  ;;  %v361_v47 = vsel %vm1531_vm2, %v1226_v34, %v360_v38  ;;  %v303_v49 = vshll.u32 %v187_v45, 16  ;;  %v1632_v13 = vld [vmem:[%s1515_s17 + $0x40] sm:$0xf] }
  0x19   : > { %v365_v48 = vsel %vm1531_vm2, %v1227_v39, %v364_v40  ;;  %v384_v50 = vrot.slane %v1577_v35, 5  ;;  %v289_v53 = vshll.u32 %v1577_v35, 16  ;;  %v1233_v54 = vrot.slane %v1589_v41, 9  ;;  %v1704_v4 = vld [vmem:[%s1515_s17 + $0x48] sm:$0xf] }
  0x1a   : > { %v1252_v51 = vcombine.low %v361_v47, %v365_v48  ;;  %v1602_v52 = vcombine.low %v365_v48, %v369_v37  ;;  %v1606_v55 = vrot.slane %v303_v49, 5  ;;  %v388_v57 = vrot.slane %v187_v45, 5  ;;  %v189_v37 = vld [vmem:[%s1515_s17 + $0x44] sm:$0x1] }
  0x1b   : > { %v1610_v56 = vsel %vm1531_vm2, %v1232_v46, %v384_v50  ;;  %v210_v58 = vshrl.u32 %v1556_v24, 16  ;;  %v213_v60 = vshll.u32 %v1556_v24, 16  ;;  %v224_v61 = vshrl.u32 %v1542_v17, 16 }
  0x1c   : > { %503 = vrot.lane.b32.xlu0 %v1252_v51, %s1478_s23  ;;  %v227_v62 = vshll.u32 %v1542_v17, 16  ;;  %v238_v63 = vshrl.u32 %v1518_v0, 16  ;;  %v1623_v1 = vsel %vm1531_vm2, %v1233_v54, %v388_v57  ;;  %v241_v6 = vshll.u32 %v1518_v0, 16 }
  0x1d   : > { %v212_v3 = vrot.slane %v210_v58, 4  ;;  %v252_v7 = vshrl.u32 %v1522_v2, 16  ;;  %v1629_v9 = vcombine.low %v1610_v56, %v1623_v1  ;;  %v215_v10 = vrot.slane %v213_v60, 5 }
  0x1e   : > { %v226_v11 = vrot.slane %v224_v61, 4  ;;  %v229_v12 = vrot.slane %v227_v62, 5  ;;  %v240_v14 = vrot.slane %v238_v63, 4  ;;  %v243_v16 = vrot.slane %v241_v6, 5 }
  0x1f   : > { %v254_v19 = vrot.slane %v252_v7, 4  ;;  %v255_v20 = vshll.u32 %v1522_v2, 16  ;;  %509 = vrot.lane.b32.xlu1 %v1629_v9, %s1478_s23  ;;  %v216_v21 = vor.u32 %v215_v10, %v212_v3  ;;  %v294_v28 = vshrl.u32 %v1589_v41, 16 }
  0x20   : > { %505 = vrot.lane.b32.xlu0 %v1593_v43, %s1478_s23  ;;  %v230_v22 = vor.u32 %v229_v12, %v226_v11  ;;  %v297_v29 = vshll.u32 %v1589_v41, 16  ;;  %v244_v34 = vor.u32 %v243_v16, %v240_v14  ;;  %v308_v38 = vshrl.u32 %v1632_v13, 16 }
  0x21   : > { %v257_v36 = vrot.slane %v255_v20, 5  ;;  %v311_v39 = vshll.u32 %v1632_v13, 16  ;;  %v217_v40 = vrot.slane %v216_v21, 4  ;;  %v296_v46 = vrot.slane %v294_v28, 4  ;;  %v1689_v28 = vld [vmem:[%s2051_s1 + $0x38] sm:$0xff]  }
  0x22   : > { %v231_v45 = vrot.slane %v230_v22, 4  ;;  %v299_v47 = vrot.slane %v297_v29, 5  ;;  %v245_v48 = vrot.slane %v244_v34, 4  ;;  %v310_v50 = vrot.slane %v308_v38, 4  ;;  %1363 = vmatprep.subr.bf16.mxu1 %v1689_v28 }
  0x23   : > { %v258_v49 = vor.u32 %v257_v36, %v254_v19  ;;  %v313_v51 = vrot.slane %v311_v39, 5  ;;  %v1652_v54 = vsel %vm1643_vm5, %v217_v40, %v221_v44  ;;  %v317_v59 = vshll.u32 %v189_v37, 16 }
  0x24   : > { %v236_v57 = vsel %vm1643_vm5, %v231_v45, %v1591_v42  ;;  %524 = vrot.lane.b32.xlu0 %v1602_v52, %s1477_s20  ;;  %v300_v58 = vor.u32 %v299_v47, %v296_v46  ;;  %v250_v61 = vsel %vm1643_vm5, %v245_v48, %v1558_v25  ;;  %v266_v6 = vshrl.u32 %v1529_v5, 16 }
  0x25   : > { %v1660_v60 = vcombine.low %v1652_v54, %v236_v57  ;;  %v259_v62 = vrot.slane %v258_v49, 4  ;;  %v314_v63 = vor.u32 %v313_v51, %v310_v50  ;;  %v319_v3 = vrot.slane %v317_v59, 5 }
  0x26   : > { %v301_v44 = vrot.slane %v300_v58, 4  ;;  %v269_v42 = vshll.u32 %v1529_v5, 16  ;;  %v280_v11 = vshrl.u32 %v1568_v30, 16  ;;  %v283_v25 = vshll.u32 %v1568_v30, 16 }
  0x27   : > { %511 = vrot.lane.b32.xlu1 %v1660_v60, %s1479_s24  ;;  %v264_v7 = vsel %vm1643_vm5, %v259_v62, %v1570_v31  ;;  %v315_v10 = vrot.slane %v314_v63, 4  ;;  %v268_v16 = vrot.slane %v266_v6, 4  ;;  %v1234_v22 = vrot.slane %v1632_v13, 9  ;;  %v191_v62 = vld [vmem:[%s1515_s17 + $0x4c] sm:$0x1] }
  0x28   : > { %v1674_v12 = vcombine.low %v250_v61, %v264_v7  ;;  %507 = vrot.lane.b32.xlu0 %v1573_v32, %s1478_s23  ;;  %v1681_v14 = vsel %vm1643_vm5, %v301_v44, %v1606_v55  ;;  %v271_v19 = vrot.slane %v269_v42, 5  ;;  %v282_v20 = vrot.slane %v280_v11, 4 }
  0x29   : > { %v320_v31 = vsel %vm1643_vm5, %v315_v10, %v319_v3  ;;  %v285_v21 = vrot.slane %v283_v25, 5  ;;  %v277_v29 = vrot.slane %v275_v15, 5  ;;  %v392_v34 = vrot.slane %v189_v37, 5 }
  0x2a   : > { %v272_v55 = vor.u32 %v271_v19, %v268_v16  ;;  %v291_v36 = vrot.slane %v289_v53, 5  ;;  %v1698_v38 = vcombine.low %v1681_v14, %v320_v31  ;;  %v322_v46 = vshrl.u32 %v1704_v4, 16 }
  0x2b   : > { %513 = vrot.lane.b32.xlu1 %v1674_v12, %s1479_s24  ;;  %v286_v39 = vor.u32 %v285_v21, %v282_v20  ;;  %v393_v45 = vsel %vm1531_vm2, %v1234_v22, %v392_v34  ;;  %v325_v48 = vshll.u32 %v1704_v4, 16  ;;  %v1258_v49 = vcombine.low %v1562_v26, %v1610_v56  ;;  %v1401_v20 = vld [vmem:[%s2051_s1 + $0x8] sm:$0xff]  }
  0x2c   : > { %v273_v40 = vrot.slane %v272_v55, 4  ;;  %v1259_v37 = vcombine.low %v1623_v1, %v393_v45  ;;  %v324_v50 = vrot.slane %v322_v46, 4  ;;  %v1724_v58 = vcombine.low %v1542_v17, %v1518_v0  ;;  %1327 = vmatprep.subr.bf16.mxu0 %v1401_v20 }
  0x2d   : > { %v287_v15 = vrot.slane %v286_v39, 4  ;;  %v327_v51 = vrot.slane %v325_v48, 5  ;;  %v1728_v1 = vcombine.low %v1522_v2, %v1529_v5  ;;  %v1732_v59 = vcombine.low %v1568_v30, %v1589_v41  ;;  %1328 = vmatpush3.bf16.msra.mxu0 %v1401_v20 }
  0x2e   : > { %v278_v35 = vsel %vm1643_vm5, %v273_v40, %v277_v29  ;;  %v331_v63 = vshll.u32 %v191_v62, 16  ;;  %v1742_v44 = vcombine.low %v236_v57, %v250_v61  ;;  %v196_v3 = vshrl.u32 %v1545_v18, 16  ;;  %1329 = vmatprep.subr.bf16.mxu0 %v1402_v8 }
  0x2f   : > { %517 = vrot.lane.b32.xlu1 %v1698_v38, %s1479_s24  ;;  %v292_v53 = vsel %vm1643_vm5, %v287_v15, %v291_v36  ;;  %v1738_v26 = vcombine.low %v264_v7, %v278_v35  ;;  %v328_v56 = vor.u32 %v327_v51, %v324_v50  ;;  %v199_v6 = vshll.u32 %v1545_v18, 16 }
  0x30   : > { %v1714_v47 = vcombine.low %v278_v35, %v292_v53  ;;  %v333_v10 = vrot.slane %v331_v63, 5  ;;  %v1235_v57 = vrot.slane %v1704_v4, 9  ;;  %v396_v61 = vrot.slane %v191_v62, 5  ;;  %v1397_v35 = vld [vmem:[%s2051_s1 + $0x30] sm:$0xff]  }
  0x31   : > { %v329_v42 = vrot.slane %v328_v56, 4  ;;  %v201_v7 = vrot.slane %v199_v6, 5  ;;  %v205_v11 = vshll.u32 %v1553_v23, 16  ;;  %1330 = vmatpush3.bf16.msra.mxu0 %v1402_v8  ;;  %v1786_v29 = vcombine.low %v1518_v0, %v1522_v2  ;;  %v1810_v2 = vld [vmem:[%s2051_s1 + $0x28] sm:$0xff]  }
  0x32   : > { %515 = vrot.lane.b32.xlu0 %v1714_v47, %s1479_s24  ;;  %v397_v19 = vsel %vm1531_vm2, %v1235_v57, %v396_v61  ;;  %v1791_v33 = vcombine.low %v1556_v24, %v1542_v17  ;;  %v1805_v0 = vcombine.low %v1589_v41, %v1632_v13  ;;  %v1816_v17 = vcombine.low %v1529_v5, %v1568_v30 }
  0x33   : > { %530 = vrot.lane.b32.xlu1 %v1259_v37, %s1477_s20  ;;  %v1270_v23 = vcombine.low %v393_v45, %v397_v19  ;;  %v207_v21 = vrot.slane %v205_v11, 5  ;;  %1351 = vmatprep.subr.bf16.mxu0 %v1810_v2  ;;  %v1264_v5 = vcombine.low %v1632_v13, %v1704_v4 }
  0x36   : > { %528 = vrot.lane.b32.xlu0 %v1258_v49, %s1477_s20 }
  0x37   : > { %628 = vrot.lane.b32.xlu1 %v1564_v27, %s1478_s23  ;;  %v198_v27 = vrot.slane %v196_v3, 4 }
  0x39   : > { %v202_v16 = vor.u32 %v201_v7, %v198_v27 }
  0x3a   : > { %626 = vrot.lane.b32.xlu0 %v1602_v52, %s1478_s23  ;;  %v334_v52 = vsel %vm1643_vm5, %v329_v42, %v333_v10 }
  0x3b   : > { %636 = vrot.lane.b32.xlu1 %v1738_v26, %s1479_s24  ;;  %v1265_v25 = vcombine.low %v320_v31, %v334_v52  ;;  %v203_v31 = vrot.slane %v202_v16, 4 }
  0x3e   : > { %634 = vrot.lane.b32.xlu0 %v1742_v44, %s1479_s24 }
  0x3f   : > { %646 = vrot.lane.b32.xlu1 %v1573_v32, %s1477_s20  ;;  %v1236_v32 = vcombine.low %v1545_v18, %v1556_v24 }
  0x42   : > { %644 = vrot.lane.b32.xlu0 %v1593_v43, %s1477_s20  ;;  %v1768_v43 = vcombine.low %v292_v53, %v1681_v14  ;;  %v208_v14 = vsel %vm1643_vm5, %v203_v31, %v207_v21 }
  0x43   : > { %632 = vrot.lane.b32.xlu1 %v1259_v37, %s1478_s23  ;;  %v1240_v22 = vcombine.low %v208_v14, %v1652_v54 }
  0x46   : > { %630 = vrot.lane.b32.xlu0 %v1258_v49, %s1478_s23 }
  0x47   : > { %640 = vrot.lane.b32.xlu1 %v1265_v25, %s1479_s24 }
  0x4a   : > { %638 = vrot.lane.b32.xlu0 %v1768_v43, %s1479_s24 }
  0x4b   : > { %650 = vrot.lane.b32.xlu1 %v1270_v23, %s1477_s20 }
  0x4e   : > { %648 = vrot.lane.b32.xlu0 %v1629_v9, %s1477_s20 }
  0x4f   : > { %424 = vrot.lane.b32.xlu1 %v1742_v44, %s1478_s23 }
  0x52   : > { %422 = vrot.lane.b32.xlu0 %v1240_v22, %s1478_s23 }
  0x53   : > { %437 = vrot.lane.b32.xlu1 %v1786_v29, %s1479_s24 }
  0x56   : > { %435 = vrot.lane.b32.xlu0 %v1791_v33, %s1479_s24 }
  0x57   : > { %450 = vrot.lane.b32.xlu1 %v1674_v12, %s1477_s20 }
  0x5a   : > { %448 = vrot.lane.b32.xlu0 %v1660_v60, %s1477_s20 }
  0x5b   : > { %428 = vrot.lane.b32.xlu1 %v1768_v43, %s1478_s23 }
  0x5e   : > { %426 = vrot.lane.b32.xlu0 %v1738_v26, %s1478_s23 }
  0x5f   : > { %441 = vrot.lane.b32.xlu1 %v1805_v0, %s1479_s24 }
  0x62   : > { %439 = vrot.lane.b32.xlu0 %v1816_v17, %s1479_s24 }
  0x63   : > { %454 = vrot.lane.b32.xlu1 %v1698_v38, %s1477_s20 }
  0x66   : > { %452 = vrot.lane.b32.xlu0 %v1714_v47, %s1477_s20 }
  0x67   : > { %567 = vrot.lane.b32.xlu1 %v1674_v12, %s1478_s23 }
  0x6a   : > { %565 = vrot.lane.b32.xlu0 %v1660_v60, %s1478_s23 }
  0x6b   : > { %577 = vrot.lane.b32.xlu1 %v1728_v1, %s1479_s24 }
  0x6e   : > { %575 = vrot.lane.b32.xlu0 %v1724_v58, %s1479_s24 }
  0x6f   : > { %587 = vrot.lane.b32.xlu1 %v1738_v26, %s1477_s20 }
  0x72   : > { %585 = vrot.lane.b32.xlu0 %v1742_v44, %s1477_s20 }
  0x73   : > { %571 = vrot.lane.b32.xlu1 %v1698_v38, %s1478_s23 }
  0x76   : > { %569 = vrot.lane.b32.xlu0 %v1714_v47, %s1478_s23 }
  0x77   : > { %581 = vrot.lane.b32.xlu1 %v1264_v5, %s1479_s24 }
  0x7a   : > { %579 = vrot.lane.b32.xlu0 %v1732_v59, %s1479_s24 }
  0x7b   : > { %591 = vrot.lane.b32.xlu1 %v1265_v25, %s1477_s20 }
  0x7e   : > { %589 = vrot.lane.b32.xlu0 %v1768_v43, %s1477_s20 }
  0x89   : > { %v527_v30 = vpop.permute.xlu1 %526 }
  0x8e   : > { %v504_v41 = vpop.permute.xlu0 %503 }
  0x8f   : > { %v534_v55 = vsel %vm456_vm6, %v1240_v22, %v504_v41 }
  0x91   : > { %v510_v54 = vpop.permute.xlu1 %509 }
  0x92   : > { %v506_v9 = vpop.permute.xlu0 %505  ;;  %v543_v49 = vsel %vm456_vm6, %v1768_v43, %v510_v54 }
  0x93   : > { %v537_v40 = vsel %vm456_vm6, %v1742_v44, %v506_v9 }
  0x96   : > { %v525_v13 = vpop.permute.xlu0 %524 }
  0x99   : > { %v512_v34 = vpop.permute.xlu1 %511 }
  0x9a   : > { %v545_v36 = vsel %vm469_vm7, %v534_v55, %v512_v34  ;;  %v508_v15 = vpop.permute.xlu0 %507 }
  0x9b   : > { %v553_v39 = vsel %vm478_vm8, %v545_v36, %v525_v13  ;;  %v540_v50 = vsel %vm456_vm6, %v1738_v26, %v508_v15 }
  0x9c   : > { %1343 = vmatprep.mubr.msk.bf16.mxu1 %vm704_vm9, %v553_v39 }
  0x9d   : > { %v514_v45 = vpop.permute.xlu1 %513 }
  0x9e   : > { %v547_v4 = vsel %vm469_vm7, %v537_v40, %v514_v45 }
  0x9f   : > { %v555_v53 = vsel %vm478_vm8, %v547_v4, %v527_v30 }
  0xa0   : > { %1344 = vmatmul.mubr.msk.bf16.vlgmr.msra.gmra.mxu1 %vm704_vm9, %v555_v53 }
  0xa1   : > { %v518_v37 = vpop.permute.xlu1 %517  ;;  %1364 = vmatpush3.bf16.msra.mxu1 %v1689_v28 }
  0xa2   : > { %1365 = vmatprep.subr.bf16.mxu1 %v1397_v35  ;;  %v551_v51 = vsel %vm469_vm7, %v543_v49, %v518_v37 }
  0xa4   : > { %v516_v46 = vpop.permute.xlu0 %515 }
  0xa5   : > { %v531_v48 = vpop.permute.xlu1 %530  ;;  %1366 = vmatpush3.bf16.msra.mxu1 %v1397_v35  ;;  %v549_v62 = vsel %vm469_vm7, %v540_v50, %v516_v46 }
  0xa6   : > { %v559_v56 = vsel %vm478_vm8, %v551_v51, %v531_v48 }
  0xa8   : > { %v529_v63 = vpop.permute.xlu0 %528 }
  0xa9   : > { %v557_v44 = vsel %vm478_vm8, %v549_v62, %v529_v63  ;;  %v629_v28 = vpop.permute.xlu1 %628 }
  0xaa   : > { %1347 = vmatprep.mubr.msk.bf16.mxu1 %vm704_vm9, %v557_v44  ;;  %v657_v26 = vsel %vm456_vm6, %v1674_v12, %v629_v28 }
  0xab   : > { %1348 = vmatmul.mubr.msk.bf16.gmra.mxu1 %vm704_vm9, %v559_v56 }
  0xac   : > { %v627_v3 = vpop.permute.xlu0 %626 }
  0xad   : > { %v637_v6 = vpop.permute.xlu1 %636  ;;  %v654_v27 = vsel %vm456_vm6, %v1660_v60, %v627_v3 }
  0xae   : > { %v667_v7 = vsel %vm469_vm7, %v657_v26, %v637_v6 }
  0xb0   : > { %v635_v42 = vpop.permute.xlu0 %634 }
  0xb1   : > { %v647_v10 = vpop.permute.xlu1 %646  ;;  %v665_v52 = vsel %vm469_vm7, %v654_v27, %v635_v42 }
  0xb2   : > { %v675_v57 = vsel %vm478_vm8, %v667_v7, %v647_v10 }
  0xb4   : > { %v645_v61 = vpop.permute.xlu0 %644 }
  0xb5   : > { %v673_v11 = vsel %vm478_vm8, %v665_v52, %v645_v61  ;;  %v633_v25 = vpop.permute.xlu1 %632 }
  0xb6   : > { %1367 = vmatprep.mubr.msk.bf16.mxu1 %vm704_vm9, %v673_v11  ;;  %v663_v60 = vsel %vm456_vm6, %v1698_v38, %v633_v25 }
  0xb7   : > { %1368 = vmatmul.mubr.msk.bf16.vlgmr.msra.gmra.mxu1 %vm704_vm9, %v675_v57 }
  0xb8   : > { %v631_v16 = vpop.permute.xlu0 %630 }
  0xb9   : > { %v641_v19 = vpop.permute.xlu1 %640  ;;  %v660_v43 = vsel %vm456_vm6, %v1714_v47, %v631_v16 }
  0xba   : > { %v671_v23 = vsel %vm469_vm7, %v663_v60, %v641_v19 }
  0xbc   : > { %v639_v12 = vpop.permute.xlu0 %638 }
  0xbd   : > { %v651_v20 = vpop.permute.xlu1 %650  ;;  %v669_v31 = vsel %vm469_vm7, %v660_v43, %v639_v12 }
  0xbe   : > { %v679_v21 = vsel %vm478_vm8, %v671_v23, %v651_v20 }
  0xc0   : > { %v649_v8 = vpop.permute.xlu0 %648 }
  0xc1   : > { %v677_v14 = vsel %vm478_vm8, %v669_v31, %v649_v8  ;;  %v425_v22 = vpop.permute.xlu1 %424 }
  0xc2   : > { %1371 = vmatprep.mubr.msk.bf16.mxu1 %vm704_vm9, %v677_v14  ;;  %v462_v38 = vsel %vm456_vm6, %v1724_v58, %v425_v22  ;;  %v1404_v58 = vld [vmem:[%s2051_s1 + $0x20] sm:$0xff]  }
  0xc3   : > { %1372 = vmatmul.mubr.msk.bf16.gmra.mxu1 %vm704_vm9, %v679_v21 }
  0xc4   : > { %v423_v5 = vpop.permute.xlu0 %422 }
  0xc5   : > { %v438_v30 = vpop.permute.xlu1 %437  ;;  %v459_v47 = vsel %vm456_vm6, %v1236_v32, %v423_v5 }
  0xc6   : > { %v473_v9 = vsel %vm469_vm7, %v462_v38, %v438_v30 }
  0xc8   : > { %v436_v41 = vpop.permute.xlu0 %435 }
  0xc9   : > { %v451_v54 = vpop.permute.xlu1 %450  ;;  %v471_v13 = vsel %vm469_vm7, %v459_v47, %v436_v41 }
  0xca   : > { %v482_v34 = vsel %vm478_vm8, %v473_v9, %v451_v54 }
  0xcc   : > { %v449_v55 = vpop.permute.xlu0 %448 }
  0xcd   : > { %v480_v36 = vsel %vm478_vm8, %v471_v13, %v449_v55  ;;  %v429_v39 = vpop.permute.xlu1 %428 }
  0xce   : > { %1331 = vmatprep.mubr.msk.bf16.mxu0 %vm704_vm9, %v480_v36  ;;  %v468_v32 = vsel %vm456_vm6, %v1732_v59, %v429_v39 }
  0xcf   : > { %1332 = vmatmul.mubr.msk.bf16.vlgmr.msra.gmra.mxu0 %vm704_vm9, %v482_v34 }
  0xd0   : > { %v427_v18 = vpop.permute.xlu0 %426  ;;  %1352 = vmatpush3.bf16.msra.mxu0 %v1810_v2 }
  0xd1   : > { %v442_v24 = vpop.permute.xlu1 %441  ;;  %1353 = vmatprep.subr.bf16.mxu0 %v1404_v58  ;;  %v465_v40 = vsel %vm456_vm6, %v1728_v1, %v427_v18 }
  0xd2   : > { %v477_v4 = vsel %vm469_vm7, %v468_v32, %v442_v24 }
  0xd4   : > { %v440_v45 = vpop.permute.xlu0 %439  ;;  %1354 = vmatpush3.bf16.msra.mxu0 %v1404_v58 }
  0xd5   : > { %v455_v15 = vpop.permute.xlu1 %454  ;;  %v475_v35 = vsel %vm469_vm7, %v465_v40, %v440_v45 }
  0xd6   : > { %v486_v37 = vsel %vm478_vm8, %v477_v4, %v455_v15 }
  0xd8   : > { %v453_v53 = vpop.permute.xlu0 %452 }
  0xd9   : > { %v484_v2 = vsel %vm478_vm8, %v475_v35, %v453_v53  ;;  %v568_v46 = vpop.permute.xlu1 %567 }
  0xda   : > { %1335 = vmatprep.mubr.msk.bf16.mxu0 %vm704_vm9, %v484_v2  ;;  %v598_v1 = vsel %vm456_vm6, %v1786_v29, %v568_v46 }
  0xdb   : > { %1336 = vmatmul.mubr.msk.bf16.gmra.mxu0 %vm704_vm9, %v486_v37 }
  0xdc   : > { %v566_v59 = vpop.permute.xlu0 %565 }
  0xdd   : > { %v578_v48 = vpop.permute.xlu1 %577  ;;  %v595_v49 = vsel %vm456_vm6, %v1791_v33, %v566_v59 }
  0xde   : > { %v608_v51 = vsel %vm469_vm7, %v598_v1, %v578_v48 }
  0xe0   : > { %v576_v50 = vpop.permute.xlu0 %575 }
  0xe1   : > { %v588_v62 = vpop.permute.xlu1 %587  ;;  %v606_v56 = vsel %vm469_vm7, %v595_v49, %v576_v50 }
  0xe2   : > { %v616_v44 = vsel %vm478_vm8, %v608_v51, %v588_v62 }
  0xe4   : > { %v586_v63 = vpop.permute.xlu0 %585 }
  0xe5   : > { %v614_v28 = vsel %vm478_vm8, %v606_v56, %v586_v63  ;;  %v572_v3 = vpop.permute.xlu1 %571 }
  0xe6   : > { %1355 = vmatprep.mubr.msk.bf16.mxu0 %vm704_vm9, %v614_v28  ;;  %v604_v33 = vsel %vm456_vm6, %v1805_v0, %v572_v3  ;;  %v1943_v0 = vld [vmem:[%s2052_s2] ss:$0 sm:$0xff] }
  0xe7   : > { %1356 = vmatmul.mubr.msk.bf16.vlgmr.msra.gmra.mxu0 %vm704_vm9, %v616_v44 }
  0xe8   : > { %v570_v29 = vpop.permute.xlu0 %569 }
  0xe9   : > { %v582_v6 = vpop.permute.xlu1 %581  ;;  %v601_v42 = vsel %vm456_vm6, %v1816_v17, %v570_v29 }
  0xea   : > { %v612_v26 = vsel %vm469_vm7, %v604_v33, %v582_v6 }
  0xec   : > { %v580_v10 = vpop.permute.xlu0 %579 }
  0xed   : > { %v592_v27 = vpop.permute.xlu1 %591  ;;  %v610_v7 = vsel %vm469_vm7, %v601_v42, %v580_v10 }
  0xee   : > { %v620_v57 = vsel %vm478_vm8, %v612_v26, %v592_v27 }
  0xf0   : > { %v590_v52 = vpop.permute.xlu0 %589 }
  0xf1   : > { %v618_v61 = vsel %vm478_vm8, %v610_v7, %v590_v52 }
  0xf2   : > { %1359 = vmatprep.mubr.msk.bf16.mxu0 %vm704_vm9, %v618_v61 }
  0xf3   : > { %1360 = vmatmul.mubr.msk.bf16.gmra.mxu0 %vm704_vm9, %v620_v57 }
 0x160   : > { %v1345_v17 = vpop.f32.mrf.mxu1 }
 0x161   : > { %v849_v11 = vadd.f32 %v1345_v17, %v1943_v0 }
 0x162   : > { %v840_v25 = vpop.f32.mrf.mxu1 }
 0x163   : > { %1405 = vtanh.f32 %v849_v11  ;;  %v841_v16 = vadd.f32 %v1943_v0, %v840_v25 }
 0x164   : > { %v1346_v19 = vpop.f32.mrf.mxu1 }
 0x165   : > { %v852_v12 = vadd.f32 %v1346_v19, %v1943_v0  ;;  %1407 = vtanh.f32 %v841_v16 }
 0x166   : > { %v843_v20 = vpop.f32.mrf.mxu1 }
 0x167   : > { %1409 = vtanh.f32 %v852_v12  ;;  %v844_v60 = vadd.f32 %v1943_v0, %v843_v20 }
 0x169   : > { %1411 = vtanh.f32 %v844_v60 }
 0x16b   : > { %v1349_v43 = vpop.f32.mrf.mxu1 }
 0x16c   : > { %v865_v23 = vadd.f32 %v1349_v43, %v1943_v0 }
 0x16d   : > { %v856_v31 = vpop.f32.mrf.mxu1 }
 0x16e   : > { %1413 = vtanh.f32 %v865_v23  ;;  %v857_v21 = vadd.f32 %v1943_v0, %v856_v31 }
 0x16f   : > { %v1350_v8 = vpop.f32.mrf.mxu1 }
 0x170   : > { %v1406_v14 = vpop.eup %1405  ;;  %v868_v22 = vadd.f32 %v1350_v8, %v1943_v0  ;;  %1415 = vtanh.f32 %v857_v21 }
 0x171   : > { %v859_v5 = vpop.f32.mrf.mxu1  ;;  %1077 = vrot.lane.b32.xlu0 %v1406_v14, %s1480_s14 }
 0x172   : > { %1417 = vtanh.f32 %v868_v22  ;;  %v860_v30 = vadd.f32 %v1943_v0, %v859_v5  ;;  %v1408_v38 = vpop.eup %1407 }
 0x174   : > { %v1410_v47 = vpop.eup %1409  ;;  %1419 = vtanh.f32 %v860_v30 }
 0x175   : > { %1079 = vrot.lane.b32.xlu1 %v1410_v47, %s1480_s14  ;;  %1073 = vrot.lane.b32.xlu0 %v1408_v38, %s1480_s14 }
 0x176   : > { %v1412_v9 = vpop.eup %1411 }
 0x177   : > { %v1369_v41 = vpop.f32.mrf.mxu1 }
 0x178   : > { %v1035_v54 = vadd.f32 %v1369_v41, %v1943_v0 }
 0x179   : > { %v1026_v13 = vpop.f32.mrf.mxu1  ;;  %1075 = vrot.lane.b32.xlu1 %v1412_v9, %s1480_s14 }
 0x17a   : > { %1421 = vtanh.f32 %v1035_v54  ;;  %v1027_v55 = vadd.f32 %v1943_v0, %v1026_v13 }
 0x17b   : > { %v1414_v34 = vpop.eup %1413  ;;  %v1370_v36 = vpop.f32.mrf.mxu1 }
 0x17c   : > { %v1038_v39 = vadd.f32 %v1370_v36, %v1943_v0  ;;  %1085 = vrot.lane.b32.xlu0 %v1414_v34, %s1480_s14  ;;  %1423 = vtanh.f32 %v1027_v55 }
 0x17d   : > { %v1029_v58 = vpop.f32.mrf.mxu1  ;;  %v1416_v18 = vpop.eup %1415 }
 0x17e   : > { %1425 = vtanh.f32 %v1038_v39  ;;  %v1030_v24 = vadd.f32 %v1943_v0, %v1029_v58 }
 0x17f   : > { %v1418_v32 = vpop.eup %1417 }
 0x180   : > { %1087 = vrot.lane.b32.xlu1 %v1418_v32, %s1480_s14  ;;  %1081 = vrot.lane.b32.xlu0 %v1416_v18, %s1480_s14  ;;  %1427 = vtanh.f32 %v1030_v24 }
 0x181   : > { %v1420_v40 = vpop.eup %1419 }
 0x183   : > { %v1373_v45 = vpop.f32.mrf.mxu1 }
 0x184   : > { %1083 = vrot.lane.b32.xlu1 %v1420_v40, %s1480_s14  ;;  %v1051_v53 = vadd.f32 %v1373_v45, %v1943_v0 }
 0x185   : > { %v1042_v4 = vpop.f32.mrf.mxu1 }
 0x186   : > { %v1043_v15 = vadd.f32 %v1943_v0, %v1042_v4 }
 0x187   : > { %v1422_v35 = vpop.eup %1421  ;;  %v1374_v37 = vpop.f32.mrf.mxu1 }
 0x188   : > { %1429 = vtanh.f32 %v1043_v15  ;;  %1118 = vrot.lane.b32.xlu0 %v1422_v35, %s1480_s14  ;;  %v1054_v1 = vadd.f32 %v1374_v37, %v1943_v0 }
 0x189   : > { %v1045_v2 = vpop.f32.mrf.mxu1  ;;  %v1424_v46 = vpop.eup %1423  ;;  %1431 = vtanh.f32 %v1051_v53 }
 0x18a   : > { %v1046_v59 = vadd.f32 %v1943_v0, %v1045_v2 }
 0x18b   : > { %v1426_v48 = vpop.eup %1425 }
 0x18c   : > { %1433 = vtanh.f32 %v1046_v59  ;;  %1120 = vrot.lane.b32.xlu1 %v1426_v48, %s1480_s14  ;;  %1114 = vrot.lane.b32.xlu0 %v1424_v46, %s1480_s14 }
 0x18d   : > { %v1428_v49 = vpop.eup %1427  ;;  %1435 = vtanh.f32 %v1054_v1 }
 0x18f   : > { %v1333_v63 = vpop.f32.mrf.mxu0 }
 0x190   : > { %1116 = vrot.lane.b32.xlu1 %v1428_v49, %s1480_s14  ;;  %v756_v6 = vadd.f32 %v1333_v63, %v1943_v0 }
 0x191   : > { %v747_v44 = vpop.f32.mrf.mxu0 }
 0x192   : > { %v748_v42 = vadd.f32 %v1943_v0, %v747_v44  ;;  %1437 = vtanh.f32 %v756_v6 }
 0x193   : > { %v1334_v28 = vpop.f32.mrf.mxu0 }
 0x194   : > { %v759_v10 = vadd.f32 %v1334_v28, %v1943_v0  ;;  %1439 = vtanh.f32 %v748_v42 }
 0x195   : > { %v1430_v50 = vpop.eup %1429  ;;  %v750_v3 = vpop.f32.mrf.mxu0 }
 0x196   : > { %1122 = vrot.lane.b32.xlu0 %v1430_v50, %s1480_s14  ;;  %v1432_v51 = vpop.eup %1431  ;;  %1441 = vtanh.f32 %v759_v10  ;;  %v751_v27 = vadd.f32 %v1943_v0, %v750_v3 }
 0x198   : > { %1443 = vtanh.f32 %v751_v27 }
 0x199   : > { %v1434_v62 = vpop.eup %1433 }
 0x19a   : > { %1124 = vrot.lane.b32.xlu1 %v1434_v62, %s1480_s14  ;;  %1126 = vrot.lane.b32.xlu0 %v1432_v51, %s1480_s14  ;;  %v1436_v56 = vpop.eup %1435 }
 0x19b   : > { %v1337_v29 = vpop.f32.mrf.mxu0 }
 0x19c   : > { %v772_v52 = vadd.f32 %v1337_v29, %v1943_v0 }
 0x19d   : > { %v763_v33 = vpop.f32.mrf.mxu0 }
 0x19e   : > { %1128 = vrot.lane.b32.xlu1 %v1436_v56, %s1480_s14  ;;  %v764_v61 = vadd.f32 %v1943_v0, %v763_v33  ;;  %1445 = vtanh.f32 %v772_v52 }
 0x19f   : > { %v1338_v26 = vpop.f32.mrf.mxu0  ;;  %v1438_v25 = vpop.eup %1437 }
 0x1a0   : > { %v775_v17 = vadd.f32 %v1338_v26, %v1943_v0  ;;  %1447 = vtanh.f32 %v764_v61 }
 0x1a1   : > { %v766_v7 = vpop.f32.mrf.mxu0  ;;  %v1440_v20 = vpop.eup %1439 }
 0x1a2   : > { %1449 = vtanh.f32 %v775_v17  ;;  %v767_v12 = vadd.f32 %v1943_v0, %v766_v7 }
 0x1a3   : > { %v1442_v43 = vpop.eup %1441 }
 0x1a4   : > { %1451 = vtanh.f32 %v767_v12 }
 0x1a5   : > { %v1444_v5 = vpop.eup %1443 }
 0x1a7   : > { %v1357_v57 = vpop.f32.mrf.mxu0 }
 0x1a8   : > { %v942_v14 = vadd.f32 %v1357_v57, %v1943_v0 }
 0x1a9   : > { %v933_v11 = vpop.f32.mrf.mxu0 }
 0x1aa   : > { %v934_v38 = vadd.f32 %v1943_v0, %v933_v11  ;;  %1453 = vtanh.f32 %v942_v14 }
 0x1ab   : > { %v1358_v60 = vpop.f32.mrf.mxu0  ;;  %v1446_v54 = vpop.eup %1445 }
 0x1ac   : > { %v945_v9 = vadd.f32 %v1358_v60, %v1943_v0  ;;  %1455 = vtanh.f32 %v934_v38 }
 0x1ad   : > { %v936_v22 = vpop.f32.mrf.mxu0  ;;  %v1448_v36 = vpop.eup %1447 }
 0x1ae   : > { %1457 = vtanh.f32 %v945_v9  ;;  %v937_v39 = vadd.f32 %v1943_v0, %v936_v22 }
 0x1af   : > { %v1450_v58 = vpop.eup %1449 }
 0x1b0   : > { %1459 = vtanh.f32 %v937_v39 }
 0x1b1   : > { %v1452_v4 = vpop.eup %1451 }
 0x1b3   : > { %v1361_v47 = vpop.f32.mrf.mxu0 }
 0x1b4   : > { %v958_v46 = vadd.f32 %v1361_v47, %v1943_v0 }
 0x1b5   : > { %v949_v34 = vpop.f32.mrf.mxu0 }
 0x1b6   : > { %v950_v35 = vadd.f32 %v1943_v0, %v949_v34 }
 0x1b7   : > { %v1362_v45 = vpop.f32.mrf.mxu0  ;;  %v1454_v2 = vpop.eup %1453 }
 0x1b8   : > { %1461 = vtanh.f32 %v950_v35  ;;  %v961_v56 = vadd.f32 %v1362_v45, %v1943_v0 }
 0x1b9   : > { %v952_v37 = vpop.f32.mrf.mxu0  ;;  %v1456_v49 = vpop.eup %1455  ;;  %1463 = vtanh.f32 %v958_v46 }
 0x1ba   : > { %v953_v48 = vadd.f32 %v1943_v0, %v952_v37 }
 0x1bb   : > { %v1458_v50 = vpop.eup %1457 }
 0x1bc   : > { %1465 = vtanh.f32 %v953_v48 }
 0x1bd   : > { %v1460_v28 = vpop.eup %1459  ;;  %1467 = vtanh.f32 %v961_v56 }
 0x1c5   : > { %v1462_v0 = vpop.eup %1461 }
 0x1c6   : > { %v1464_v42 = vpop.eup %1463 }
 0x1c9   : > { %v1466_v10 = vpop.eup %1465 }
 0x1ca   : > { %v1468_v57 = vpop.eup %1467 }
 0x1e3   : > { %v1078_v16 = vpop.permute.xlu0 %1077 }
 0x1e4   : > { %v1100_v19 = vsel %vm1097_vm10, %v1438_v25, %v1078_v16 }
 0x1e5   : > { %1151 = vst.msk [vmem:[%s1988_s18 + $0x20] sm:$0xff] %vm1146_vm11, %v1100_v19 }
 0x1e7   : > { %v1080_v23 = vpop.permute.xlu1 %1079  ;;  %v1074_v31 = vpop.permute.xlu0 %1073 }
 0x1e8   : > { %v1101_v21 = vsel %vm1097_vm10, %v1442_v43, %v1080_v23  ;;  %v1098_v8 = vsel %vm1097_vm10, %v1440_v20, %v1074_v31 }
 0x1e9   : > { %1153 = vst.msk [vmem:[%s1988_s18 + $0x30] sm:$0xff] %vm1146_vm11, %v1101_v21  ;;  %1147 = vst.msk [vmem:[%s1988_s18] sm:$0xff] %vm1146_vm11, %v1098_v8 }
 0x1eb   : > { %v1076_v30 = vpop.permute.xlu1 %1075 }
 0x1ec   : > { %v1099_v41 = vsel %vm1097_vm10, %v1444_v5, %v1076_v30 }
 0x1ed   : > { %1149 = vst.msk [vmem:[%s1988_s18 + $0x10] sm:$0xff] %vm1146_vm11, %v1099_v41 }
 0x1ee   : > { %v1086_v13 = vpop.permute.xlu0 %1085 }
 0x1ef   : > { %v1104_v55 = vsel %vm1097_vm10, %v1446_v54, %v1086_v13 }
 0x1f0   : > { %1159 = vst.msk [vmem:[%s1988_s18 + $0x60] sm:$0xff] %vm1146_vm11, %v1104_v55 }
 0x1f2   : > { %v1088_v18 = vpop.permute.xlu1 %1087  ;;  %v1082_v24 = vpop.permute.xlu0 %1081 }
 0x1f3   : > { %v1105_v32 = vsel %vm1097_vm10, %v1450_v58, %v1088_v18  ;;  %v1102_v40 = vsel %vm1097_vm10, %v1448_v36, %v1082_v24 }
 0x1f4   : > { %1161 = vst.msk [vmem:[%s1988_s18 + $0x70] sm:$0xff] %vm1146_vm11, %v1105_v32  ;;  %1155 = vst.msk [vmem:[%s1988_s18 + $0x40] sm:$0xff] %vm1146_vm11, %v1102_v40 }
 0x1f6   : > { %v1084_v15 = vpop.permute.xlu1 %1083 }
 0x1f7   : > { %v1103_v53 = vsel %vm1097_vm10, %v1452_v4, %v1084_v15 }
 0x1f8   : > { %1157 = vst.msk [vmem:[%s1988_s18 + $0x50] sm:$0xff] %vm1146_vm11, %v1103_v53 }
 0x1fa   : > { %v1119_v59 = vpop.permute.xlu0 %1118 }
 0x1fb   : > { %v1140_v1 = vsel %vm1097_vm10, %v1454_v2, %v1119_v59 }
 0x1fc   : > { %1152 = vst.msk [vmem:[%s1988_s18 + $0x28] sm:$0xff] %vm1146_vm11, %v1140_v1 }
 0x1fe   : > { %v1121_v51 = vpop.permute.xlu1 %1120  ;;  %v1115_v62 = vpop.permute.xlu0 %1114 }
 0x1ff   : > { %v1141_v63 = vsel %vm1097_vm10, %v1458_v50, %v1121_v51  ;;  %v1138_v44 = vsel %vm1097_vm10, %v1456_v49, %v1115_v62 }
 0x200   : > { %1154 = vst.msk [vmem:[%s1988_s18 + $0x38] sm:$0xff] %vm1146_vm11, %v1141_v63  ;;  %1148 = vst.msk [vmem:[%s1988_s18 + $0x8] sm:$0xff] %vm1146_vm11, %v1138_v44 }
 0x202   : > { %v1117_v3 = vpop.permute.xlu1 %1116 }
 0x203   : > { %v1139_v29 = vsel %vm1097_vm10, %v1460_v28, %v1117_v3 }
 0x204   : > { %1150 = vst.msk [vmem:[%s1988_s18 + $0x18] sm:$0xff] %vm1146_vm11, %v1139_v29 }
 0x208   : > { %v1123_v6 = vpop.permute.xlu0 %1122 }
 0x209   : > { %v1142_v33 = vsel %vm1097_vm10, %v1462_v0, %v1123_v6 }
 0x20a   : > { %1156 = vst.msk [vmem:[%s1988_s18 + $0x48] sm:$0xff] %vm1146_vm11, %v1142_v33 }
 0x20c   : > { %v1125_v26 = vpop.permute.xlu1 %1124  ;;  %v1127_v27 = vpop.permute.xlu0 %1126 }
 0x20d   : > { %v1143_v7 = vsel %vm1097_vm10, %v1466_v10, %v1125_v26  ;;  %v1144_v52 = vsel %vm1097_vm10, %v1464_v42, %v1127_v27 }
 0x20e   : > { %1158 = vst.msk [vmem:[%s1988_s18 + $0x58] sm:$0xff] %vm1146_vm11, %v1143_v7  ;;  %1160 = vst.msk [vmem:[%s1988_s18 + $0x68] sm:$0xff] %vm1146_vm11, %v1144_v52 }
 0x210   : > { %v1129_v61 = vpop.permute.xlu1 %1128 }
 0x211   : > { %v1145_v17 = vsel %vm1097_vm10, %v1468_v57, %v1129_v61 }
 0x212   : > { %1162 = vst.msk [vmem:[%s1988_s18 + $0x78] sm:$0xff] %vm1146_vm11, %v1145_v17 }
 0x213 PF: > { %s13_s12 = sadd.s32 1, %s1475_s12  }
 0x214   : > { %p10_p4 = scmp.ge.s32.totalorder %s13_s12, 4  }
 0x216   :  { %12 = sbr.rel (!%p10_p4) target bundleno = 1 (0x1), region = 65 }

</bundles_post_ra>
